<compile_context>
chip_gen: v5e
topology: v5e:2x2
jax: 0.10.0
libtpu: 0.0.40
codegen_flags: <defaults>
</compile_context>

<pallas_src>
import functools
import math

import jax
import jax.numpy as jnp
from jax.experimental import pallas as pl
from jax.experimental.pallas import tpu as pltpu


def _round_up(x, m):
    return ((x + m - 1) // m) * m


def _choose_ts(T, cap=16):
    """Largest divisor of T that is <= cap (timesteps blocked per grid step)."""
    ts = min(T, cap)
    while T % ts:
        ts -= 1
    return max(ts, 1)


# ----------------------------------------------------------------------------
# Pallas kernel: one LIF layer, TS timesteps per grid step, whole sequence in
# one launch.  All refs are 2-D [rows, features], time-major row blocks.
# ----------------------------------------------------------------------------
def _lif_layer_kernel(sin_ref, p0_ref, q0_ref, r0_ref, s0_ref, w_ref, b_ref,
                      # outputs
                      s_seq_ref, u_seq_ref, p_ref, q_ref, r_ref, s_ref,
                      # scratch
                      p_blk_ref, u_blk_ref,
                      *, alpha, beta, tau_m, tau_s, alpharp, wrp,
                      ts, bsz, emit_seq):
    # Load the initial state into the VMEM-resident state blocks once.
    @pl.when(pl.program_id(0) == 0)
    def _():
        p_ref[...] = p0_ref[...]
        q_ref[...] = q0_ref[...]
        r_ref[...] = r0_ref[...]
        s_ref[...] = s0_ref[...]

    # Hoisted resident operands: loaded once per grid step, outside the TS loop.
    w = w_ref[...]                     # (Nin, Nout) bf16, resident
    bias = b_ref[...]                  # (1, Nout) f32, broadcast once below

    # --- Phase 1: P/Q recurrence over the TS steps (VPU, f32). P depends only
    # on the input stream, so stage every step's membrane trace for one big
    # MXU matmul instead of TS tiny M=bsz matmuls.
    p = p_ref[...]
    q = q_ref[...]
    for i in range(ts):                          # static unroll, TS <= 16
        sin_i = sin_ref[pl.ds(i * bsz, bsz), :].astype(jnp.float32)
        p = alpha * p + tau_m * q                # uses OLD Q (decolle order)
        q = beta * q + tau_s * sin_i
        p_blk_ref[pl.ds(i * bsz, bsz), :] = p.astype(jnp.bfloat16)
    p_ref[...] = p
    q_ref[...] = q

    # --- Phase 2: one (TS*B, Nin) @ (Nin, Nout) bf16 matmul, f32 accumulate.
    u_blk_ref[...] = (
        jnp.dot(p_blk_ref[...], w, preferred_element_type=jnp.float32) + bias)

    # --- Phase 3: sequential refractory / threshold recurrence (VPU only).
    r = r_ref[...]
    s = s_ref[...]
    u_i = u_blk_ref[pl.ds(0, bsz), :]            # placeholder init (overwritten)
    for i in range(ts):
        r = alpharp * r - s * wrp
        u_i = u_blk_ref[pl.ds(i * bsz, bsz), :] + r
        s = (u_i >= 0.0).astype(jnp.float32)
        s_seq_ref[pl.ds(i * bsz, bsz), :] = s.astype(s_seq_ref.dtype)  # bf16 stream
        if emit_seq:
            u_seq_ref[pl.ds(i * bsz, bsz), :] = u_i
    if not emit_seq:
        u_seq_ref[...] = u_i                     # resident block: last-step U only
    r_ref[...] = r
    s_ref[...] = s


def _lif_layer_call(sin_seq, P0, Q0, R0, S0, W, b,
                    *, lif_consts, emit_seq, num_steps, ts):
    """sin_seq: (T*B, Nin) time-major rows (bf16). Runs all T steps, TS per grid
    step, in one kernel. Returns (S_seq bf16, U_seq, Pn, Qn, Rn, Sn)."""
    T = num_steps
    TB, Nin = sin_seq.shape
    B = TB // T
    Nout = W.shape[1]
    alpha, beta, tau_m, tau_s, alpharp, wrp = lif_consts
    kernel = functools.partial(
        _lif_layer_kernel, alpha=alpha, beta=beta, tau_m=tau_m, tau_s=tau_s,
        alpharp=alpharp, wrp=wrp, ts=ts, bsz=B, emit_seq=emit_seq)

    blk_map = lambda g: (g, 0)       # new (ts*B)-row block each grid step
    const_map = lambda g: (0, 0)     # resident block (DMA once / write once)
    u_rows = TB if emit_seq else B
    u_map = blk_map if emit_seq else const_map
    u_blk = (ts * B, Nout) if emit_seq else (B, Nout)

    out_shapes = (
        jax.ShapeDtypeStruct((TB, Nout), jnp.bfloat16),     # spikes, every step
        jax.ShapeDtypeStruct((u_rows, Nout), jnp.float32),  # membrane U
        jax.ShapeDtypeStruct((B, Nin), jnp.float32),        # final P
        jax.ShapeDtypeStruct((B, Nin), jnp.float32),        # final Q
        jax.ShapeDtypeStruct((B, Nout), jnp.float32),       # final R
        jax.ShapeDtypeStruct((B, Nout), jnp.float32),       # final S
    )
    grid_spec = pltpu.PrefetchScalarGridSpec(
        num_scalar_prefetch=0,
        grid=(T // ts,),
        in_specs=[
            pl.BlockSpec((ts * B, Nin), blk_map),    # Sin block (bf16)
            pl.BlockSpec((B, Nin), const_map),       # P0 (fetched once)
            pl.BlockSpec((B, Nin), const_map),       # Q0
            pl.BlockSpec((B, Nout), const_map),      # R0
            pl.BlockSpec((B, Nout), const_map),      # S0
            pl.BlockSpec((Nin, Nout), const_map),    # W (resident, bf16)
            pl.BlockSpec((1, Nout), const_map),      # b
        ],
        out_specs=(
            pl.BlockSpec((ts * B, Nout), blk_map),   # spike stream (feeds next layer)
            pl.BlockSpec(u_blk, u_map),              # U per-step, or last-step resident
            pl.BlockSpec((B, Nin), const_map),       # final state = VMEM carry
            pl.BlockSpec((B, Nin), const_map),
            pl.BlockSpec((B, Nout), const_map),
            pl.BlockSpec((B, Nout), const_map),
        ),
        scratch_shapes=[
            pltpu.VMEM((ts * B, Nin), jnp.bfloat16),   # staged P traces (matmul lhs)
            pltpu.VMEM((ts * B, Nout), jnp.float32),   # U_base = P@W + b for the block
        ],
    )
    return pl.pallas_call(
        kernel,
        out_shape=out_shapes,
        grid_spec=grid_spec,
        compiler_params=pltpu.CompilerParams(
            dimension_semantics=("arbitrary",),        # time axis carries state
            vmem_limit_bytes=32 * 1024 * 1024),
    )(sin_seq, P0, Q0, R0, S0, W, b)


def _run_net_impl(x_seq, states, params, *, emit_seq, lif_consts, num_steps, ts):
    """Runs the layer chain; one gridded pallas_call per layer for all T steps.
    The local readout is hoisted out of the recurrence as one batched matmul."""
    s_all, r_all, u_all, new_states = [], [], [], []
    inp = x_seq                                   # (T*B, F) bf16 spike stream
    for st, (W, b, Wro, bro) in zip(states, params):
        S_seq, U_seq, Pn, Qn, Rn, Sn = _lif_layer_call(
            inp, st["P"], st["Q"], st["R"], st["S"], W, b,
            lif_consts=lif_consts, emit_seq=emit_seq,
            num_steps=num_steps, ts=ts)
        new_states.append(dict(P=Pn, Q=Qn, R=Rn, S=Sn))
        if emit_seq:
            # Full-sequence readout: one (T*B, Nout) @ (Nout, Nro) matmul.
            ro = jnp.dot(S_seq, Wro, preferred_element_type=jnp.float32) + bro
        else:
            # Burn-in: no per-step readout work; report last-step readout only.
            ro = jnp.dot(Sn.astype(jnp.bfloat16), Wro,
                         preferred_element_type=jnp.float32) + bro
        s_all.append(S_seq)
        r_all.append(ro)
        u_all.append(U_seq)
        inp = S_seq    # bf16 spikes (detached in torch) feed the next LIF layer
    return s_all, r_all, u_all, new_states


# ----------------------------------------------------------------------------
# DECOLLEBase equivalent (JAX / Pallas): LIF_layers + readout_layers structure.
# ----------------------------------------------------------------------------
class DECOLLEBaseJax:
    requires_init = True

    def __init__(self, in_features, hidden_features, out_features, key,
                 alpha=0.9, beta=0.85, alpharp=0.65, wrp=1.0, lc_ampl=0.5,
                 lane_pad=128, ts_cap=16):
        tau_m = 1.0 / (1.0 - alpha)
        tau_s = 1.0 / (1.0 - beta)
        self._lif_consts = (float(alpha), float(beta), float(tau_m),
                            float(tau_s), float(alpharp), float(wrp))
        self.in_features = in_features
        self.out_features = out_features
        self.ts_cap = int(ts_cap)
        self.nro_pad = _round_up(out_features, lane_pad)   # lane-dense readout

        dims = [in_features] + list(hidden_features)
        self.layer_dims = list(zip(dims[:-1], dims[1:]))
        dims_pad = [_round_up(d, lane_pad) for d in dims]
        self.layer_dims_pad = list(zip(dims_pad[:-1], dims_pad[1:]))

        # Deterministic parameter init (uniform, nn.Linear / reset_lc_parameters
        # conventions), zero-padded to MXU-friendly shapes; weights in bf16.
        # TODO(synk): switch W to f32 if exact spike match vs. torch f32 is needed.
        self.LIF_layers = []      # list of (W, b)
        self.readout_layers = []  # list of (Wro, bro)
        for (nin, nout), (nin_p, nout_p) in zip(self.layer_dims,
                                                self.layer_dims_pad):
            key, k1, k2, k3, k4 = jax.random.split(key, 5)
            stdv = 1.0 / math.sqrt(nin)
            W = jax.random.uniform(k1, (nin, nout), jnp.float32, -stdv, stdv)
            b = jax.random.uniform(k2, (1, nout), jnp.float32, -stdv, stdv)
            stdv_lc = lc_ampl / math.sqrt(nout)
            Wro = jax.random.uniform(k3, (nout, out_features), jnp.float32,
                                     -stdv_lc, stdv_lc)
            bro = jax.random.uniform(k4, (1, out_features), jnp.float32,
                                     -stdv_lc, stdv_lc)
            W_p = jnp.zeros((nin_p, nout_p), jnp.float32).at[:nin, :nout].set(W)
            b_p = jnp.zeros((1, nout_p), jnp.float32).at[:, :nout].set(b)
            Wro_p = jnp.zeros((nout_p, self.nro_pad), jnp.float32
                              ).at[:nout, :out_features].set(Wro)
            bro_p = jnp.zeros((1, self.nro_pad), jnp.float32
                              ).at[:, :out_features].set(bro)
            self.LIF_layers.append((W_p.astype(jnp.bfloat16), b_p))
            self.readout_layers.append((Wro_p.astype(jnp.bfloat16), bro_p))

        self.params = [(W, b, Wro, bro) for (W, b), (Wro, bro)
                       in zip(self.LIF_layers, self.readout_layers)]
        self.state = None   # list of dicts {P, Q, R, S}, padded [B_pad, *]
        self._run = jax.jit(
            _run_net_impl,
            static_argnames=("emit_seq", "lif_consts", "num_steps", "ts"))

    def __len__(self):
        return len(self.LIF_layers)

    @property
    def output_layer(self):
        return self.readout_layers[-1]

    def _zero_state(self, batch_pad):
        st = []
        for (nin_p, nout_p) in self.layer_dims_pad:
            st.append(dict(
                P=jnp.zeros((batch_pad, nin_p), jnp.float32),
                Q=jnp.zeros((batch_pad, nin_p), jnp.float32),
                R=jnp.zeros((batch_pad, nout_p), jnp.float32),
                S=jnp.zeros((batch_pad, nout_p), jnp.float32)))
        return st

    def forward_seq(self, Sin_seq, emit_seq=True):
        """Sin_seq: [B, T, C, W]. Runs T timesteps with the time loop fused
        inside the kernel (TS timesteps per grid step). Returns per-layer lists
        of [T,B,nout] spikes, [T,B,out_features] readouts, [T,B,nout] U."""
        B, T = int(Sin_seq.shape[0]), int(Sin_seq.shape[1])
        x = Sin_seq.reshape(B, T, -1).astype(jnp.float32)     # flatten C*W
        x = jnp.transpose(x, (1, 0, 2))                       # [T, B, F]
        B_pad = _round_up(B, 16)                              # bf16 sublane tile
        F_pad = self.layer_dims_pad[0][0]
        x = jnp.pad(x, ((0, 0), (0, B_pad - B), (0, F_pad - x.shape[-1])))
        # bf16 spike stream (inputs are 0/1 spikes -> exact in bf16).
        x = x.reshape(T * B_pad, F_pad).astype(jnp.bfloat16)
        ts = _choose_ts(T, self.ts_cap)

        if self.state is None or self.state[0]["P"].shape[0] != B_pad:
            self.state = self._zero_state(B_pad)

        s_all, r_all, u_all, new_state = self._run(
            x, self.state, self.params,
            emit_seq=emit_seq, lif_consts=self._lif_consts,
            num_steps=T, ts=ts)
        self.state = new_state

        # Slice off batch / lane padding for the caller.
        s_out, r_out, u_out = [], [], []
        tr = T if emit_seq else 1
        for (nin, nout), s, r, u in zip(self.layer_dims, s_all, r_all, u_all):
            s_out.append(s.reshape(T, B_pad, -1)[:, :B, :nout]
                         .astype(jnp.float32))
            r_out.append(r.reshape(tr, B_pad, -1)[:, :B, :self.out_features])
            u_out.append(u.reshape(tr, B_pad, -1)[:, :B, :nout])
        return s_out, r_out, u_out

    def forward(self, Sin_t):
        """One timestep [B, C, W] -> (s_out, r_out, u_out) per-layer lists.
        NOTE: prefer forward_seq over chunks of 32-128 steps in training loops;
        T=1 calls pay the full pipeline prologue per layer."""
        s_seq, r_seq, u_seq = self.forward_seq(Sin_t[:, None, ...])
        return ([s[0] for s in s_seq], [r[0] for r in r_seq],
                [u[0] for u in u_seq])

    def init(self, data_batch, burnin):
        """DECOLLEBase.init: reset state, burn in over max(len(self), burnin)
        timesteps — fused into one gridded kernel per layer, no readout work."""
        if self.requires_init is False:
            return
        self.state = None
        # NOTE: like the torch reference, burnin must not exceed the data's T.
        nsteps = max(len(self), burnin)
        self.forward_seq(data_batch[:, :nsteps], emit_seq=False)

    # TODO(synk): get_trainable_parameters / named-parameter queries / device
    # queries / init_parameters are host-side nn.Module bookkeeping with no
    # kernel equivalent.


# ----------------------------------------------------------------------------
if __name__ == "__main__":
    key = jax.random.PRNGKey(0)
    kdata, kparams = jax.random.split(key)

    B, T, C, Wdim = 2, 8, 4, 16          # data_batch: [batch, time, channels, width]
    in_features = C * Wdim               # 64
    hidden = (128, 128)
    num_classes = 10

    # Synthetic spike-like input (bernoulli 0/1), deterministic.
    data_batch = jax.random.bernoulli(
        kdata, p=0.3, shape=(B, T, C, Wdim)).astype(jnp.float32)

    net = DECOLLEBaseJax(in_features, hidden, num_classes, kparams)

    # DECOLLEBase.init: reset state, burn in over timesteps (fused in-kernel).
    net.init(data_batch, burnin=4)

    # One more forward step (what a training loop would do per timestep).
    s_out, r_out, u_out = net.forward(data_batch[:, 0, :, :])
    jax.block_until_ready(r_out[-1])
    assert s_out[-1].shape == (B, hidden[-1])
    assert r_out[-1].shape == (B, num_classes)
    assert u_out[-1].shape == (B, hidden[-1])

    # Whole-sequence forward: one fused kernel launch per layer for all T steps.
    s_seq, r_seq, u_seq = net.forward_seq(data_batch)
    jax.block_until_ready(r_seq[-1])
    assert s_seq[-1].shape == (T, B, hidden[-1])
    assert r_seq[-1].shape == (T, B, num_classes)
    assert u_seq[-1].shape == (T, B, hidden[-1])
    assert bool(jnp.all(jnp.isfinite(r_seq[-1])))
    print("KERNEL_OK")
</pallas_src>

<mosaic_0001>
module attributes {stable_mosaic.version = 11 : i64} {
  func.func @_lif_layer_kernel(%arg0: i32, %arg1: memref<64x128xbf16, #tpu.memory_space<vmem>>, %arg2: memref<16x128xf32, #tpu.memory_space<vmem>>, %arg3: memref<16x128xf32, #tpu.memory_space<vmem>>, %arg4: memref<16x128xf32, #tpu.memory_space<vmem>>, %arg5: memref<16x128xf32, #tpu.memory_space<vmem>>, %arg6: memref<128x128xbf16, #tpu.memory_space<vmem>>, %arg7: memref<1x128xf32, #tpu.memory_space<vmem>>, %arg8: memref<64x128xbf16, #tpu.memory_space<vmem>>, %arg9: memref<16x128xf32, #tpu.memory_space<vmem>>, %arg10: memref<16x128xf32, #tpu.memory_space<vmem>>, %arg11: memref<16x128xf32, #tpu.memory_space<vmem>>, %arg12: memref<16x128xf32, #tpu.memory_space<vmem>>, %arg13: memref<16x128xf32, #tpu.memory_space<vmem>>, %arg14: memref<64x128xbf16, #tpu.memory_space<vmem>>, %arg15: memref<64x128xf32, #tpu.memory_space<vmem>>) attributes {dimension_semantics = [#tpu.dimension_semantics<arbitrary>], iteration_bounds = array<i64: 1>, scalar_prefetch = 0 : i64, scratch_operands = 2 : i64, tpu.core_type = #tpu.core_type<tc>, window_params = [{transform_indices = @transform_0, window_bounds = array<i64: 64, 128>}, {pipeline_mode = #tpu.pipeline_mode<synchronous>, transform_indices = @transform_1, window_bounds = array<i64: 16, 128>}, {pipeline_mode = #tpu.pipeline_mode<synchronous>, transform_indices = @transform_2, window_bounds = array<i64: 16, 128>}, {pipeline_mode = #tpu.pipeline_mode<synchronous>, transform_indices = @transform_3, window_bounds = array<i64: 16, 128>}, {pipeline_mode = #tpu.pipeline_mode<synchronous>, transform_indices = @transform_4, window_bounds = array<i64: 16, 128>}, {pipeline_mode = #tpu.pipeline_mode<synchronous>, transform_indices = @transform_5, window_bounds = array<i64: 128, 128>}, {pipeline_mode = #tpu.pipeline_mode<synchronous>, transform_indices = @transform_6, window_bounds = array<i64: 1, 128>}, {transform_indices = @transform_7, window_bounds = array<i64: 64, 128>}, {pipeline_mode = #tpu.pipeline_mode<synchronous>, transform_indices = @transform_8, window_bounds = array<i64: 16, 128>}, {pipeline_mode = #tpu.pipeline_mode<synchronous>, transform_indices = @transform_9, window_bounds = array<i64: 16, 128>}, {pipeline_mode = #tpu.pipeline_mode<synchronous>, transform_indices = @transform_10, window_bounds = array<i64: 16, 128>}, {pipeline_mode = #tpu.pipeline_mode<synchronous>, transform_indices = @transform_11, window_bounds = array<i64: 16, 128>}, {pipeline_mode = #tpu.pipeline_mode<synchronous>, transform_indices = @transform_12, window_bounds = array<i64: 16, 128>}]} {
    %c0_i32 = arith.constant 0 : i32
    %0 = arith.cmpi eq, %arg0, %c0_i32 : i32
    %1 = arith.extui %0 : i1 to i32
    %c0_i32_0 = arith.constant 0 : i32
    %2 = arith.cmpi ne, %1, %c0_i32_0 : i32
    scf.if %2 {
      %c0_83 = arith.constant 0 : index
      %c0_84 = arith.constant 0 : index
      %127 = vector.load %arg2[%c0_83, %c0_84] : memref<16x128xf32, #tpu.memory_space<vmem>>, vector<16x128xf32>
      %c0_85 = arith.constant 0 : index
      %c0_86 = arith.constant 0 : index
      %128 = vector.load %arg10[%c0_85, %c0_86] : memref<16x128xf32, #tpu.memory_space<vmem>>, vector<16x128xf32>
      tpu.vector_store %arg10[%c0_85, %c0_86], %127 {strides = array<i32>} : memref<16x128xf32, #tpu.memory_space<vmem>>, vector<16x128xf32>,
      %c0_87 = arith.constant 0 : index
      %c0_88 = arith.constant 0 : index
      %129 = vector.load %arg3[%c0_87, %c0_88] : memref<16x128xf32, #tpu.memory_space<vmem>>, vector<16x128xf32>
      %c0_89 = arith.constant 0 : index
      %c0_90 = arith.constant 0 : index
      %130 = vector.load %arg11[%c0_89, %c0_90] : memref<16x128xf32, #tpu.memory_space<vmem>>, vector<16x128xf32>
      tpu.vector_store %arg11[%c0_89, %c0_90], %129 {strides = array<i32>} : memref<16x128xf32, #tpu.memory_space<vmem>>, vector<16x128xf32>,
      %c0_91 = arith.constant 0 : index
      %c0_92 = arith.constant 0 : index
      %131 = vector.load %arg4[%c0_91, %c0_92] : memref<16x128xf32, #tpu.memory_space<vmem>>, vector<16x128xf32>
      %c0_93 = arith.constant 0 : index
      %c0_94 = arith.constant 0 : index
      %132 = vector.load %arg12[%c0_93, %c0_94] : memref<16x128xf32, #tpu.memory_space<vmem>>, vector<16x128xf32>
      tpu.vector_store %arg12[%c0_93, %c0_94], %131 {strides = array<i32>} : memref<16x128xf32, #tpu.memory_space<vmem>>, vector<16x128xf32>,
      %c0_95 = arith.constant 0 : index
      %c0_96 = arith.constant 0 : index
      %133 = vector.load %arg5[%c0_95, %c0_96] : memref<16x128xf32, #tpu.memory_space<vmem>>, vector<16x128xf32>
      %c0_97 = arith.constant 0 : index
      %c0_98 = arith.constant 0 : index
      %134 = vector.load %arg13[%c0_97, %c0_98] : memref<16x128xf32, #tpu.memory_space<vmem>>, vector<16x128xf32>
      tpu.vector_store %arg13[%c0_97, %c0_98], %133 {strides = array<i32>} : memref<16x128xf32, #tpu.memory_space<vmem>>, vector<16x128xf32>,
    } else {
    }
    %c0 = arith.constant 0 : index
    %c0_1 = arith.constant 0 : index
    %3 = vector.load %arg6[%c0, %c0_1] : memref<128x128xbf16, #tpu.memory_space<vmem>>, vector<128x128xbf16>
    %c0_2 = arith.constant 0 : index
    %c0_3 = arith.constant 0 : index
    %4 = vector.load %arg7[%c0_2, %c0_3] : memref<1x128xf32, #tpu.memory_space<vmem>>, vector<1x128xf32>
    %c0_4 = arith.constant 0 : index
    %c0_5 = arith.constant 0 : index
    %5 = vector.load %arg10[%c0_4, %c0_5] : memref<16x128xf32, #tpu.memory_space<vmem>>, vector<16x128xf32>
    %c0_6 = arith.constant 0 : index
    %c0_7 = arith.constant 0 : index
    %6 = vector.load %arg11[%c0_6, %c0_7] : memref<16x128xf32, #tpu.memory_space<vmem>>, vector<16x128xf32>
    %c0_8 = arith.constant 0 : index
    %c0_9 = arith.constant 0 : index
    %7 = vector.load %arg1[%c0_8, %c0_9] : memref<64x128xbf16, #tpu.memory_space<vmem>>, vector<16x128xbf16>
    %8 = arith.extf %7 : vector<16x128xbf16> to vector<16x128xf32>
    %cst = arith.constant 0.899999976 : f32
    %9 = vector.broadcast %cst : f32 to vector<16x128xf32>
    %10 = arith.mulf %9, %5 : vector<16x128xf32>
    %cst_10 = arith.constant 1.000000e+01 : f32
    %11 = vector.broadcast %cst_10 : f32 to vector<16x128xf32>
    %12 = arith.mulf %11, %6 : vector<16x128xf32>
    %13 = arith.addf %10, %12 : vector<16x128xf32>
    %cst_11 = arith.constant 8.500000e-01 : f32
    %14 = vector.broadcast %cst_11 : f32 to vector<16x128xf32>
    %15 = arith.mulf %14, %6 : vector<16x128xf32>
    %cst_12 = arith.constant 6.66666651 : f32
    %16 = vector.broadcast %cst_12 : f32 to vector<16x128xf32>
    %17 = arith.mulf %16, %8 : vector<16x128xf32>
    %18 = arith.addf %15, %17 : vector<16x128xf32>
    %19 = arith.truncf %13 : vector<16x128xf32> to vector<16x128xbf16>
    %c0_13 = arith.constant 0 : index
    %c0_14 = arith.constant 0 : index
    %20 = vector.load %arg14[%c0_13, %c0_14] : memref<64x128xbf16, #tpu.memory_space<vmem>>, vector<16x128xbf16>
    tpu.vector_store %arg14[%c0_13, %c0_14], %19 {strides = array<i32>} : memref<64x128xbf16, #tpu.memory_space<vmem>>, vector<16x128xbf16>,
    %c16 = arith.constant 16 : index
    %c0_15 = arith.constant 0 : index
    %21 = vector.load %arg1[%c16, %c0_15] : memref<64x128xbf16, #tpu.memory_space<vmem>>, vector<16x128xbf16>
    %22 = arith.extf %21 : vector<16x128xbf16> to vector<16x128xf32>
    %cst_16 = arith.constant 0.899999976 : f32
    %23 = vector.broadcast %cst_16 : f32 to vector<16x128xf32>
    %24 = arith.mulf %23, %13 : vector<16x128xf32>
    %cst_17 = arith.constant 1.000000e+01 : f32
    %25 = vector.broadcast %cst_17 : f32 to vector<16x128xf32>
    %26 = arith.mulf %25, %18 : vector<16x128xf32>
    %27 = arith.addf %24, %26 : vector<16x128xf32>
    %cst_18 = arith.constant 8.500000e-01 : f32
    %28 = vector.broadcast %cst_18 : f32 to vector<16x128xf32>
    %29 = arith.mulf %28, %18 : vector<16x128xf32>
    %cst_19 = arith.constant 6.66666651 : f32
    %30 = vector.broadcast %cst_19 : f32 to vector<16x128xf32>
    %31 = arith.mulf %30, %22 : vector<16x128xf32>
    %32 = arith.addf %29, %31 : vector<16x128xf32>
    %33 = arith.truncf %27 : vector<16x128xf32> to vector<16x128xbf16>
    %c16_20 = arith.constant 16 : index
    %c0_21 = arith.constant 0 : index
    %34 = vector.load %arg14[%c16_20, %c0_21] : memref<64x128xbf16, #tpu.memory_space<vmem>>, vector<16x128xbf16>
    tpu.vector_store %arg14[%c16_20, %c0_21], %33 {strides = array<i32>} : memref<64x128xbf16, #tpu.memory_space<vmem>>, vector<16x128xbf16>,
    %c32 = arith.constant 32 : index
    %c0_22 = arith.constant 0 : index
    %35 = vector.load %arg1[%c32, %c0_22] : memref<64x128xbf16, #tpu.memory_space<vmem>>, vector<16x128xbf16>
    %36 = arith.extf %35 : vector<16x128xbf16> to vector<16x128xf32>
    %cst_23 = arith.constant 0.899999976 : f32
    %37 = vector.broadcast %cst_23 : f32 to vector<16x128xf32>
    %38 = arith.mulf %37, %27 : vector<16x128xf32>
    %cst_24 = arith.constant 1.000000e+01 : f32
    %39 = vector.broadcast %cst_24 : f32 to vector<16x128xf32>
    %40 = arith.mulf %39, %32 : vector<16x128xf32>
    %41 = arith.addf %38, %40 : vector<16x128xf32>
    %cst_25 = arith.constant 8.500000e-01 : f32
    %42 = vector.broadcast %cst_25 : f32 to vector<16x128xf32>
    %43 = arith.mulf %42, %32 : vector<16x128xf32>
    %cst_26 = arith.constant 6.66666651 : f32
    %44 = vector.broadcast %cst_26 : f32 to vector<16x128xf32>
    %45 = arith.mulf %44, %36 : vector<16x128xf32>
    %46 = arith.addf %43, %45 : vector<16x128xf32>
    %47 = arith.truncf %41 : vector<16x128xf32> to vector<16x128xbf16>
    %c32_27 = arith.constant 32 : index
    %c0_28 = arith.constant 0 : index
    %48 = vector.load %arg14[%c32_27, %c0_28] : memref<64x128xbf16, #tpu.memory_space<vmem>>, vector<16x128xbf16>
    tpu.vector_store %arg14[%c32_27, %c0_28], %47 {strides = array<i32>} : memref<64x128xbf16, #tpu.memory_space<vmem>>, vector<16x128xbf16>,
    %c48 = arith.constant 48 : index
    %c0_29 = arith.constant 0 : index
    %49 = vector.load %arg1[%c48, %c0_29] : memref<64x128xbf16, #tpu.memory_space<vmem>>, vector<16x128xbf16>
    %50 = arith.extf %49 : vector<16x128xbf16> to vector<16x128xf32>
    %cst_30 = arith.constant 0.899999976 : f32
    %51 = vector.broadcast %cst_30 : f32 to vector<16x128xf32>
    %52 = arith.mulf %51, %41 : vector<16x128xf32>
    %cst_31 = arith.constant 1.000000e+01 : f32
    %53 = vector.broadcast %cst_31 : f32 to vector<16x128xf32>
    %54 = arith.mulf %53, %46 : vector<16x128xf32>
    %55 = arith.addf %52, %54 : vector<16x128xf32>
    %cst_32 = arith.constant 8.500000e-01 : f32
    %56 = vector.broadcast %cst_32 : f32 to vector<16x128xf32>
    %57 = arith.mulf %56, %46 : vector<16x128xf32>
    %cst_33 = arith.constant 6.66666651 : f32
    %58 = vector.broadcast %cst_33 : f32 to vector<16x128xf32>
    %59 = arith.mulf %58, %50 : vector<16x128xf32>
    %60 = arith.addf %57, %59 : vector<16x128xf32>
    %61 = arith.truncf %55 : vector<16x128xf32> to vector<16x128xbf16>
    %c48_34 = arith.constant 48 : index
    %c0_35 = arith.constant 0 : index
    %62 = vector.load %arg14[%c48_34, %c0_35] : memref<64x128xbf16, #tpu.memory_space<vmem>>, vector<16x128xbf16>
    tpu.vector_store %arg14[%c48_34, %c0_35], %61 {strides = array<i32>} : memref<64x128xbf16, #tpu.memory_space<vmem>>, vector<16x128xbf16>,
    %c0_36 = arith.constant 0 : index
    %c0_37 = arith.constant 0 : index
    %63 = vector.load %arg10[%c0_36, %c0_37] : memref<16x128xf32, #tpu.memory_space<vmem>>, vector<16x128xf32>
    tpu.vector_store %arg10[%c0_36, %c0_37], %55 {strides = array<i32>} : memref<16x128xf32, #tpu.memory_space<vmem>>, vector<16x128xf32>,
    %c0_38 = arith.constant 0 : index
    %c0_39 = arith.constant 0 : index
    %64 = vector.load %arg11[%c0_38, %c0_39] : memref<16x128xf32, #tpu.memory_space<vmem>>, vector<16x128xf32>
    tpu.vector_store %arg11[%c0_38, %c0_39], %60 {strides = array<i32>} : memref<16x128xf32, #tpu.memory_space<vmem>>, vector<16x128xf32>,
    %c0_40 = arith.constant 0 : index
    %c0_41 = arith.constant 0 : index
    %65 = vector.load %arg14[%c0_40, %c0_41] : memref<64x128xbf16, #tpu.memory_space<vmem>>, vector<64x128xbf16>
    %cst_42 = arith.constant dense<0.000000e+00> : vector<64x128xf32>
    %66 = tpu.matmul %65, %3, %cst_42 {dimension_numbers = #tpu.dot_dimension_numbers<[1], [0], [0], [1], [0, 0, 1, 1], [], []>} : vector<64x128xbf16>, vector<128x128xbf16>, vector<64x128xf32> -> vector<64x128xf32>
    %67 = vector.broadcast %4 : vector<1x128xf32> to vector<64x128xf32>
    %68 = arith.addf %66, %67 : vector<64x128xf32>
    %c0_43 = arith.constant 0 : index
    %c0_44 = arith.constant 0 : index
    %69 = vector.load %arg15[%c0_43, %c0_44] : memref<64x128xf32, #tpu.memory_space<vmem>>, vector<64x128xf32>
    tpu.vector_store %arg15[%c0_43, %c0_44], %68 {strides = array<i32>} : memref<64x128xf32, #tpu.memory_space<vmem>>, vector<64x128xf32>,
    %c0_45 = arith.constant 0 : index
    %c0_46 = arith.constant 0 : index
    %70 = vector.load %arg12[%c0_45, %c0_46] : memref<16x128xf32, #tpu.memory_space<vmem>>, vector<16x128xf32>
    %c0_47 = arith.constant 0 : index
    %c0_48 = arith.constant 0 : index
    %71 = vector.load %arg13[%c0_47, %c0_48] : memref<16x128xf32, #tpu.memory_space<vmem>>, vector<16x128xf32>
    %cst_49 = arith.constant 6.500000e-01 : f32
    %72 = vector.broadcast %cst_49 : f32 to vector<16x128xf32>
    %73 = arith.mulf %72, %70 : vector<16x128xf32>
    %cst_50 = arith.constant 1.000000e+00 : f32
    %74 = vector.broadcast %cst_50 : f32 to vector<16x128xf32>
    %75 = arith.mulf %71, %74 : vector<16x128xf32>
    %76 = arith.subf %73, %75 : vector<16x128xf32>
    %c0_51 = arith.constant 0 : index
    %c0_52 = arith.constant 0 : index
    %77 = vector.load %arg15[%c0_51, %c0_52] : memref<64x128xf32, #tpu.memory_space<vmem>>, vector<16x128xf32>
    %78 = arith.addf %77, %76 : vector<16x128xf32>
    %cst_53 = arith.constant 0.000000e+00 : f32
    %79 = vector.broadcast %cst_53 : f32 to vector<16x128xf32>
    %80 = arith.cmpf oge, %78, %79 : vector<16x128xf32>
    %81 = arith.extui %80 : vector<16x128xi1> to vector<16x128xi32>
    %82 = arith.sitofp %81 : vector<16x128xi32> to vector<16x128xf32>
    %83 = arith.truncf %82 : vector<16x128xf32> to vector<16x128xbf16>
    %c0_54 = arith.constant 0 : index
    %c0_55 = arith.constant 0 : index
    %84 = vector.load %arg8[%c0_54, %c0_55] : memref<64x128xbf16, #tpu.memory_space<vmem>>, vector<16x128xbf16>
    tpu.vector_store %arg8[%c0_54, %c0_55], %83 {strides = array<i32>} : memref<64x128xbf16, #tpu.memory_space<vmem>>, vector<16x128xbf16>,
    %cst_56 = arith.constant 6.500000e-01 : f32
    %85 = vector.broadcast %cst_56 : f32 to vector<16x128xf32>
    %86 = arith.mulf %85, %76 : vector<16x128xf32>
    %cst_57 = arith.constant 1.000000e+00 : f32
    %87 = vector.broadcast %cst_57 : f32 to vector<16x128xf32>
    %88 = arith.mulf %82, %87 : vector<16x128xf32>
    %89 = arith.subf %86, %88 : vector<16x128xf32>
    %c16_58 = arith.constant 16 : index
    %c0_59 = arith.constant 0 : index
    %90 = vector.load %arg15[%c16_58, %c0_59] : memref<64x128xf32, #tpu.memory_space<vmem>>, vector<16x128xf32>
    %91 = arith.addf %90, %89 : vector<16x128xf32>
    %cst_60 = arith.constant 0.000000e+00 : f32
    %92 = vector.broadcast %cst_60 : f32 to vector<16x128xf32>
    %93 = arith.cmpf oge, %91, %92 : vector<16x128xf32>
    %94 = arith.extui %93 : vector<16x128xi1> to vector<16x128xi32>
    %95 = arith.sitofp %94 : vector<16x128xi32> to vector<16x128xf32>
    %96 = arith.truncf %95 : vector<16x128xf32> to vector<16x128xbf16>
    %c16_61 = arith.constant 16 : index
    %c0_62 = arith.constant 0 : index
    %97 = vector.load %arg8[%c16_61, %c0_62] : memref<64x128xbf16, #tpu.memory_space<vmem>>, vector<16x128xbf16>
    tpu.vector_store %arg8[%c16_61, %c0_62], %96 {strides = array<i32>} : memref<64x128xbf16, #tpu.memory_space<vmem>>, vector<16x128xbf16>,
    %cst_63 = arith.constant 6.500000e-01 : f32
    %98 = vector.broadcast %cst_63 : f32 to vector<16x128xf32>
    %99 = arith.mulf %98, %89 : vector<16x128xf32>
    %cst_64 = arith.constant 1.000000e+00 : f32
    %100 = vector.broadcast %cst_64 : f32 to vector<16x128xf32>
    %101 = arith.mulf %95, %100 : vector<16x128xf32>
    %102 = arith.subf %99, %101 : vector<16x128xf32>
    %c32_65 = arith.constant 32 : index
    %c0_66 = arith.constant 0 : index
    %103 = vector.load %arg15[%c32_65, %c0_66] : memref<64x128xf32, #tpu.memory_space<vmem>>, vector<16x128xf32>
    %104 = arith.addf %103, %102 : vector<16x128xf32>
    %cst_67 = arith.constant 0.000000e+00 : f32
    %105 = vector.broadcast %cst_67 : f32 to vector<16x128xf32>
    %106 = arith.cmpf oge, %104, %105 : vector<16x128xf32>
    %107 = arith.extui %106 : vector<16x128xi1> to vector<16x128xi32>
    %108 = arith.sitofp %107 : vector<16x128xi32> to vector<16x128xf32>
    %109 = arith.truncf %108 : vector<16x128xf32> to vector<16x128xbf16>
    %c32_68 = arith.constant 32 : index
    %c0_69 = arith.constant 0 : index
    %110 = vector.load %arg8[%c32_68, %c0_69] : memref<64x128xbf16, #tpu.memory_space<vmem>>, vector<16x128xbf16>
    tpu.vector_store %arg8[%c32_68, %c0_69], %109 {strides = array<i32>} : memref<64x128xbf16, #tpu.memory_space<vmem>>, vector<16x128xbf16>,
    %cst_70 = arith.constant 6.500000e-01 : f32
    %111 = vector.broadcast %cst_70 : f32 to vector<16x128xf32>
    %112 = arith.mulf %111, %102 : vector<16x128xf32>
    %cst_71 = arith.constant 1.000000e+00 : f32
    %113 = vector.broadcast %cst_71 : f32 to vector<16x128xf32>
    %114 = arith.mulf %108, %113 : vector<16x128xf32>
    %115 = arith.subf %112, %114 : vector<16x128xf32>
    %c48_72 = arith.constant 48 : index
    %c0_73 = arith.constant 0 : index
    %116 = vector.load %arg15[%c48_72, %c0_73] : memref<64x128xf32, #tpu.memory_space<vmem>>, vector<16x128xf32>
    %117 = arith.addf %116, %115 : vector<16x128xf32>
    %cst_74 = arith.constant 0.000000e+00 : f32
    %118 = vector.broadcast %cst_74 : f32 to vector<16x128xf32>
    %119 = arith.cmpf oge, %117, %118 : vector<16x128xf32>
    %120 = arith.extui %119 : vector<16x128xi1> to vector<16x128xi32>
    %121 = arith.sitofp %120 : vector<16x128xi32> to vector<16x128xf32>
    %122 = arith.truncf %121 : vector<16x128xf32> to vector<16x128xbf16>
    %c48_75 = arith.constant 48 : index
    %c0_76 = arith.constant 0 : index
    %123 = vector.load %arg8[%c48_75, %c0_76] : memref<64x128xbf16, #tpu.memory_space<vmem>>, vector<16x128xbf16>
    tpu.vector_store %arg8[%c48_75, %c0_76], %122 {strides = array<i32>} : memref<64x128xbf16, #tpu.memory_space<vmem>>, vector<16x128xbf16>,
    %c0_77 = arith.constant 0 : index
    %c0_78 = arith.constant 0 : index
    %124 = vector.load %arg9[%c0_77, %c0_78] : memref<16x128xf32, #tpu.memory_space<vmem>>, vector<16x128xf32>
    tpu.vector_store %arg9[%c0_77, %c0_78], %117 {strides = array<i32>} : memref<16x128xf32, #tpu.memory_space<vmem>>, vector<16x128xf32>,
    %c0_79 = arith.constant 0 : index
    %c0_80 = arith.constant 0 : index
    %125 = vector.load %arg12[%c0_79, %c0_80] : memref<16x128xf32, #tpu.memory_space<vmem>>, vector<16x128xf32>
    tpu.vector_store %arg12[%c0_79, %c0_80], %115 {strides = array<i32>} : memref<16x128xf32, #tpu.memory_space<vmem>>, vector<16x128xf32>,
    %c0_81 = arith.constant 0 : index
    %c0_82 = arith.constant 0 : index
    %126 = vector.load %arg13[%c0_81, %c0_82] : memref<16x128xf32, #tpu.memory_space<vmem>>, vector<16x128xf32>
    tpu.vector_store %arg13[%c0_81, %c0_82], %121 {strides = array<i32>} : memref<16x128xf32, #tpu.memory_space<vmem>>, vector<16x128xf32>,
    return
  }
  func.func @transform_0(%arg0: i32) -> (i32, i32) {
    %c0_i32 = arith.constant 0 : i32
    %c0_i32_0 = arith.constant 0 : i32
    return %arg0, %c0_i32 : i32, i32
  }
  func.func @transform_1(%arg0: i32) -> (i32, i32) {
    %c0_i32 = arith.constant 0 : i32
    %c0_i32_0 = arith.constant 0 : i32
    %c0_i32_1 = arith.constant 0 : i32
    return %c0_i32, %c0_i32_0 : i32, i32
  }
  func.func @transform_2(%arg0: i32) -> (i32, i32) {
    %c0_i32 = arith.constant 0 : i32
    %c0_i32_0 = arith.constant 0 : i32
    %c0_i32_1 = arith.constant 0 : i32
    return %c0_i32, %c0_i32_0 : i32, i32
  }
  func.func @transform_3(%arg0: i32) -> (i32, i32) {
    %c0_i32 = arith.constant 0 : i32
    %c0_i32_0 = arith.constant 0 : i32
    %c0_i32_1 = arith.constant 0 : i32
    return %c0_i32, %c0_i32_0 : i32, i32
  }
  func.func @transform_4(%arg0: i32) -> (i32, i32) {
    %c0_i32 = arith.constant 0 : i32
    %c0_i32_0 = arith.constant 0 : i32
    %c0_i32_1 = arith.constant 0 : i32
    return %c0_i32, %c0_i32_0 : i32, i32
  }
  func.func @transform_5(%arg0: i32) -> (i32, i32) {
    %c0_i32 = arith.constant 0 : i32
    %c0_i32_0 = arith.constant 0 : i32
    %c0_i32_1 = arith.constant 0 : i32
    return %c0_i32, %c0_i32_0 : i32, i32
  }
  func.func @transform_6(%arg0: i32) -> (i32, i32) {
    %c0_i32 = arith.constant 0 : i32
    %c0_i32_0 = arith.constant 0 : i32
    %c0_i32_1 = arith.constant 0 : i32
    return %c0_i32, %c0_i32_0 : i32, i32
  }
  func.func @transform_7(%arg0: i32) -> (i32, i32) {
    %c0_i32 = arith.constant 0 : i32
    %c0_i32_0 = arith.constant 0 : i32
    return %arg0, %c0_i32 : i32, i32
  }
  func.func @transform_8(%arg0: i32) -> (i32, i32) {
    %c0_i32 = arith.constant 0 : i32
    %c0_i32_0 = arith.constant 0 : i32
    %c0_i32_1 = arith.constant 0 : i32
    return %c0_i32, %c0_i32_0 : i32, i32
  }
  func.func @transform_9(%arg0: i32) -> (i32, i32) {
    %c0_i32 = arith.constant 0 : i32
    %c0_i32_0 = arith.constant 0 : i32
    %c0_i32_1 = arith.constant 0 : i32
    return %c0_i32, %c0_i32_0 : i32, i32
  }
  func.func @transform_10(%arg0: i32) -> (i32, i32) {
    %c0_i32 = arith.constant 0 : i32
    %c0_i32_0 = arith.constant 0 : i32
    %c0_i32_1 = arith.constant 0 : i32
    return %c0_i32, %c0_i32_0 : i32, i32
  }
  func.func @transform_11(%arg0: i32) -> (i32, i32) {
    %c0_i32 = arith.constant 0 : i32
    %c0_i32_0 = arith.constant 0 : i32
    %c0_i32_1 = arith.constant 0 : i32
    return %c0_i32, %c0_i32_0 : i32, i32
  }
  func.func @transform_12(%arg0: i32) -> (i32, i32) {
    %c0_i32 = arith.constant 0 : i32
    %c0_i32_0 = arith.constant 0 : i32
    %c0_i32_1 = arith.constant 0 : i32
    return %c0_i32, %c0_i32_0 : i32, i32
  }
}

module attributes {stable_mosaic.version = 11 : i64} {
  func.func @_lif_layer_kernel(%arg0: i32, %arg1: memref<64x128xbf16, #tpu.memory_space<vmem>>, %arg2: memref<16x128xf32, #tpu.memory_space<vmem>>, %arg3: memref<16x128xf32, #tpu.memory_space<vmem>>, %arg4: memref<16x128xf32, #tpu.memory_space<vmem>>, %arg5: memref<16x128xf32, #tpu.memory_space<vmem>>, %arg6: memref<128x128xbf16, #tpu.memory_space<vmem>>, %arg7: memref<1x128xf32, #tpu.memory_space<vmem>>, %arg8: memref<64x128xbf16, #tpu.memory_space<vmem>>, %arg9: memref<16x128xf32, #tpu.memory_space<vmem>>, %arg10: memref<16x128xf32, #tpu.memory_space<vmem>>, %arg11: memref<16x128xf32, #tpu.memory_space<vmem>>, %arg12: memref<16x128xf32, #tpu.memory_space<vmem>>, %arg13: memref<16x128xf32, #tpu.memory_space<vmem>>, %arg14: memref<64x128xbf16, #tpu.memory_space<vmem>>, %arg15: memref<64x128xf32, #tpu.memory_space<vmem>>) attributes {dimension_semantics = [#tpu.dimension_semantics<arbitrary>], iteration_bounds = array<i64: 1>, scalar_prefetch = 0 : i64, scratch_operands = 2 : i64, tpu.core_type = #tpu.core_type<tc>, window_params = [{transform_indices = @transform_0, window_bounds = array<i64: 64, 128>}, {pipeline_mode = #tpu.pipeline_mode<synchronous>, transform_indices = @transform_1, window_bounds = array<i64: 16, 128>}, {pipeline_mode = #tpu.pipeline_mode<synchronous>, transform_indices = @transform_2, window_bounds = array<i64: 16, 128>}, {pipeline_mode = #tpu.pipeline_mode<synchronous>, transform_indices = @transform_3, window_bounds = array<i64: 16, 128>}, {pipeline_mode = #tpu.pipeline_mode<synchronous>, transform_indices = @transform_4, window_bounds = array<i64: 16, 128>}, {pipeline_mode = #tpu.pipeline_mode<synchronous>, transform_indices = @transform_5, window_bounds = array<i64: 128, 128>}, {pipeline_mode = #tpu.pipeline_mode<synchronous>, transform_indices = @transform_6, window_bounds = array<i64: 1, 128>}, {transform_indices = @transform_7, window_bounds = array<i64: 64, 128>}, {pipeline_mode = #tpu.pipeline_mode<synchronous>, transform_indices = @transform_8, window_bounds = array<i64: 16, 128>}, {pipeline_mode = #tpu.pipeline_mode<synchronous>, transform_indices = @transform_9, window_bounds = array<i64: 16, 128>}, {pipeline_mode = #tpu.pipeline_mode<synchronous>, transform_indices = @transform_10, window_bounds = array<i64: 16, 128>}, {pipeline_mode = #tpu.pipeline_mode<synchronous>, transform_indices = @transform_11, window_bounds = array<i64: 16, 128>}, {pipeline_mode = #tpu.pipeline_mode<synchronous>, transform_indices = @transform_12, window_bounds = array<i64: 16, 128>}]} {
    %c0_i32 = arith.constant 0 : i32
    %0 = arith.cmpi eq, %arg0, %c0_i32 : i32
    %1 = arith.extui %0 : i1 to i32
    %c0_i32_0 = arith.constant 0 : i32
    %2 = arith.cmpi ne, %1, %c0_i32_0 : i32
    scf.if %2 {
      %c0_83 = arith.constant 0 : index
      %c0_84 = arith.constant 0 : index
      %127 = vector.load %arg2[%c0_83, %c0_84] : memref<16x128xf32, #tpu.memory_space<vmem>>, vector<16x128xf32>
      %c0_85 = arith.constant 0 : index
      %c0_86 = arith.constant 0 : index
      %128 = vector.load %arg10[%c0_85, %c0_86] : memref<16x128xf32, #tpu.memory_space<vmem>>, vector<16x128xf32>
      tpu.vector_store %arg10[%c0_85, %c0_86], %127 {strides = array<i32>} : memref<16x128xf32, #tpu.memory_space<vmem>>, vector<16x128xf32>,
      %c0_87 = arith.constant 0 : index
      %c0_88 = arith.constant 0 : index
      %129 = vector.load %arg3[%c0_87, %c0_88] : memref<16x128xf32, #tpu.memory_space<vmem>>, vector<16x128xf32>
      %c0_89 = arith.constant 0 : index
      %c0_90 = arith.constant 0 : index
      %130 = vector.load %arg11[%c0_89, %c0_90] : memref<16x128xf32, #tpu.memory_space<vmem>>, vector<16x128xf32>
      tpu.vector_store %arg11[%c0_89, %c0_90], %129 {strides = array<i32>} : memref<16x128xf32, #tpu.memory_space<vmem>>, vector<16x128xf32>,
      %c0_91 = arith.constant 0 : index
      %c0_92 = arith.constant 0 : index
      %131 = vector.load %arg4[%c0_91, %c0_92] : memref<16x128xf32, #tpu.memory_space<vmem>>, vector<16x128xf32>
      %c0_93 = arith.constant 0 : index
      %c0_94 = arith.constant 0 : index
      %132 = vector.load %arg12[%c0_93, %c0_94] : memref<16x128xf32, #tpu.memory_space<vmem>>, vector<16x128xf32>
      tpu.vector_store %arg12[%c0_93, %c0_94], %131 {strides = array<i32>} : memref<16x128xf32, #tpu.memory_space<vmem>>, vector<16x128xf32>,
      %c0_95 = arith.constant 0 : index
      %c0_96 = arith.constant 0 : index
      %133 = vector.load %arg5[%c0_95, %c0_96] : memref<16x128xf32, #tpu.memory_space<vmem>>, vector<16x128xf32>
      %c0_97 = arith.constant 0 : index
      %c0_98 = arith.constant 0 : index
      %134 = vector.load %arg13[%c0_97, %c0_98] : memref<16x128xf32, #tpu.memory_space<vmem>>, vector<16x128xf32>
      tpu.vector_store %arg13[%c0_97, %c0_98], %133 {strides = array<i32>} : memref<16x128xf32, #tpu.memory_space<vmem>>, vector<16x128xf32>,
    } else {
    }
    %c0 = arith.constant 0 : index
    %c0_1 = arith.constant 0 : index
    %3 = vector.load %arg6[%c0, %c0_1] : memref<128x128xbf16, #tpu.memory_space<vmem>>, vector<128x128xbf16>
    %c0_2 = arith.constant 0 : index
    %c0_3 = arith.constant 0 : index
    %4 = vector.load %arg7[%c0_2, %c0_3] : memref<1x128xf32, #tpu.memory_space<vmem>>, vector<1x128xf32>
    %c0_4 = arith.constant 0 : index
    %c0_5 = arith.constant 0 : index
    %5 = vector.load %arg10[%c0_4, %c0_5] : memref<16x128xf32, #tpu.memory_space<vmem>>, vector<16x128xf32>
    %c0_6 = arith.constant 0 : index
    %c0_7 = arith.constant 0 : index
    %6 = vector.load %arg11[%c0_6, %c0_7] : memref<16x128xf32, #tpu.memory_space<vmem>>, vector<16x128xf32>
    %c0_8 = arith.constant 0 : index
    %c0_9 = arith.constant 0 : index
    %7 = vector.load %arg1[%c0_8, %c0_9] : memref<64x128xbf16, #tpu.memory_space<vmem>>, vector<16x128xbf16>
    %8 = arith.extf %7 : vector<16x128xbf16> to vector<16x128xf32>
    %cst = arith.constant 0.899999976 : f32
    %9 = vector.broadcast %cst : f32 to vector<16x128xf32>
    %10 = arith.mulf %9, %5 : vector<16x128xf32>
    %cst_10 = arith.constant 1.000000e+01 : f32
    %11 = vector.broadcast %cst_10 : f32 to vector<16x128xf32>
    %12 = arith.mulf %11, %6 : vector<16x128xf32>
    %13 = arith.addf %10, %12 : vector<16x128xf32>
    %cst_11 = arith.constant 8.500000e-01 : f32
    %14 = vector.broadcast %cst_11 : f32 to vector<16x128xf32>
    %15 = arith.mulf %14, %6 : vector<16x128xf32>
    %cst_12 = arith.constant 6.66666651 : f32
    %16 = vector.broadcast %cst_12 : f32 to vector<16x128xf32>
    %17 = arith.mulf %16, %8 : vector<16x128xf32>
    %18 = arith.addf %15, %17 : vector<16x128xf32>
    %19 = arith.truncf %13 : vector<16x128xf32> to vector<16x128xbf16>
    %c0_13 = arith.constant 0 : index
    %c0_14 = arith.constant 0 : index
    %20 = vector.load %arg14[%c0_13, %c0_14] : memref<64x128xbf16, #tpu.memory_space<vmem>>, vector<16x128xbf16>
    tpu.vector_store %arg14[%c0_13, %c0_14], %19 {strides = array<i32>} : memref<64x128xbf16, #tpu.memory_space<vmem>>, vector<16x128xbf16>,
    %c16 = arith.constant 16 : index
    %c0_15 = arith.constant 0 : index
    %21 = vector.load %arg1[%c16, %c0_15] : memref<64x128xbf16, #tpu.memory_space<vmem>>, vector<16x128xbf16>
    %22 = arith.extf %21 : vector<16x128xbf16> to vector<16x128xf32>
    %cst_16 = arith.constant 0.899999976 : f32
    %23 = vector.broadcast %cst_16 : f32 to vector<16x128xf32>
    %24 = arith.mulf %23, %13 : vector<16x128xf32>
    %cst_17 = arith.constant 1.000000e+01 : f32
    %25 = vector.broadcast %cst_17 : f32 to vector<16x128xf32>
    %26 = arith.mulf %25, %18 : vector<16x128xf32>
    %27 = arith.addf %24, %26 : vector<16x128xf32>
    %cst_18 = arith.constant 8.500000e-01 : f32
    %28 = vector.broadcast %cst_18 : f32 to vector<16x128xf32>
    %29 = arith.mulf %28, %18 : vector<16x128xf32>
    %cst_19 = arith.constant 6.66666651 : f32
    %30 = vector.broadcast %cst_19 : f32 to vector<16x128xf32>
    %31 = arith.mulf %30, %22 : vector<16x128xf32>
    %32 = arith.addf %29, %31 : vector<16x128xf32>
    %33 = arith.truncf %27 : vector<16x128xf32> to vector<16x128xbf16>
    %c16_20 = arith.constant 16 : index
    %c0_21 = arith.constant 0 : index
    %34 = vector.load %arg14[%c16_20, %c0_21] : memref<64x128xbf16, #tpu.memory_space<vmem>>, vector<16x128xbf16>
    tpu.vector_store %arg14[%c16_20, %c0_21], %33 {strides = array<i32>} : memref<64x128xbf16, #tpu.memory_space<vmem>>, vector<16x128xbf16>,
    %c32 = arith.constant 32 : index
    %c0_22 = arith.constant 0 : index
    %35 = vector.load %arg1[%c32, %c0_22] : memref<64x128xbf16, #tpu.memory_space<vmem>>, vector<16x128xbf16>
    %36 = arith.extf %35 : vector<16x128xbf16> to vector<16x128xf32>
    %cst_23 = arith.constant 0.899999976 : f32
    %37 = vector.broadcast %cst_23 : f32 to vector<16x128xf32>
    %38 = arith.mulf %37, %27 : vector<16x128xf32>
    %cst_24 = arith.constant 1.000000e+01 : f32
    %39 = vector.broadcast %cst_24 : f32 to vector<16x128xf32>
    %40 = arith.mulf %39, %32 : vector<16x128xf32>
    %41 = arith.addf %38, %40 : vector<16x128xf32>
    %cst_25 = arith.constant 8.500000e-01 : f32
    %42 = vector.broadcast %cst_25 : f32 to vector<16x128xf32>
    %43 = arith.mulf %42, %32 : vector<16x128xf32>
    %cst_26 = arith.constant 6.66666651 : f32
    %44 = vector.broadcast %cst_26 : f32 to vector<16x128xf32>
    %45 = arith.mulf %44, %36 : vector<16x128xf32>
    %46 = arith.addf %43, %45 : vector<16x128xf32>
    %47 = arith.truncf %41 : vector<16x128xf32> to vector<16x128xbf16>
    %c32_27 = arith.constant 32 : index
    %c0_28 = arith.constant 0 : index
    %48 = vector.load %arg14[%c32_27, %c0_28] : memref<64x128xbf16, #tpu.memory_space<vmem>>, vector<16x128xbf16>
    tpu.vector_store %arg14[%c32_27, %c0_28], %47 {strides = array<i32>} : memref<64x128xbf16, #tpu.memory_space<vmem>>, vector<16x128xbf16>,
    %c48 = arith.constant 48 : index
    %c0_29 = arith.constant 0 : index
    %49 = vector.load %arg1[%c48, %c0_29] : memref<64x128xbf16, #tpu.memory_space<vmem>>, vector<16x128xbf16>
    %50 = arith.extf %49 : vector<16x128xbf16> to vector<16x128xf32>
    %cst_30 = arith.constant 0.899999976 : f32
    %51 = vector.broadcast %cst_30 : f32 to vector<16x128xf32>
    %52 = arith.mulf %51, %41 : vector<16x128xf32>
    %cst_31 = arith.constant 1.000000e+01 : f32
    %53 = vector.broadcast %cst_31 : f32 to vector<16x128xf32>
    %54 = arith.mulf %53, %46 : vector<16x128xf32>
    %55 = arith.addf %52, %54 : vector<16x128xf32>
    %cst_32 = arith.constant 8.500000e-01 : f32
    %56 = vector.broadcast %cst_32 : f32 to vector<16x128xf32>
    %57 = arith.mulf %56, %46 : vector<16x128xf32>
    %cst_33 = arith.constant 6.66666651 : f32
    %58 = vector.broadcast %cst_33 : f32 to vector<16x128xf32>
    %59 = arith.mulf %58, %50 : vector<16x128xf32>
    %60 = arith.addf %57, %59 : vector<16x128xf32>
    %61 = arith.truncf %55 : vector<16x128xf32> to vector<16x128xbf16>
    %c48_34 = arith.constant 48 : index
    %c0_35 = arith.constant 0 : index
    %62 = vector.load %arg14[%c48_34, %c0_35] : memref<64x128xbf16, #tpu.memory_space<vmem>>, vector<16x128xbf16>
    tpu.vector_store %arg14[%c48_34, %c0_35], %61 {strides = array<i32>} : memref<64x128xbf16, #tpu.memory_space<vmem>>, vector<16x128xbf16>,
    %c0_36 = arith.constant 0 : index
    %c0_37 = arith.constant 0 : index
    %63 = vector.load %arg10[%c0_36, %c0_37] : memref<16x128xf32, #tpu.memory_space<vmem>>, vector<16x128xf32>
    tpu.vector_store %arg10[%c0_36, %c0_37], %55 {strides = array<i32>} : memref<16x128xf32, #tpu.memory_space<vmem>>, vector<16x128xf32>,
    %c0_38 = arith.constant 0 : index
    %c0_39 = arith.constant 0 : index
    %64 = vector.load %arg11[%c0_38, %c0_39] : memref<16x128xf32, #tpu.memory_space<vmem>>, vector<16x128xf32>
    tpu.vector_store %arg11[%c0_38, %c0_39], %60 {strides = array<i32>} : memref<16x128xf32, #tpu.memory_space<vmem>>, vector<16x128xf32>,
    %c0_40 = arith.constant 0 : index
    %c0_41 = arith.constant 0 : index
    %65 = vector.load %arg14[%c0_40, %c0_41] : memref<64x128xbf16, #tpu.memory_space<vmem>>, vector<64x128xbf16>
    %cst_42 = arith.constant dense<0.000000e+00> : vector<64x128xf32>
    %66 = tpu.matmul %65, %3, %cst_42 {dimension_numbers = #tpu.dot_dimension_numbers<[1], [0], [0], [1], [0, 0, 1, 1], [], []>} : vector<64x128xbf16>, vector<128x128xbf16>, vector<64x128xf32> -> vector<64x128xf32>
    %67 = vector.broadcast %4 : vector<1x128xf32> to vector<64x128xf32>
    %68 = arith.addf %66, %67 : vector<64x128xf32>
    %c0_43 = arith.constant 0 : index
    %c0_44 = arith.constant 0 : index
    %69 = vector.load %arg15[%c0_43, %c0_44] : memref<64x128xf32, #tpu.memory_space<vmem>>, vector<64x128xf32>
    tpu.vector_store %arg15[%c0_43, %c0_44], %68 {strides = array<i32>} : memref<64x128xf32, #tpu.memory_space<vmem>>, vector<64x128xf32>,
    %c0_45 = arith.constant 0 : index
    %c0_46 = arith.constant 0 : index
    %70 = vector.load %arg12[%c0_45, %c0_46] : memref<16x128xf32, #tpu.memory_space<vmem>>, vector<16x128xf32>
    %c0_47 = arith.constant 0 : index
    %c0_48 = arith.constant 0 : index
    %71 = vector.load %arg13[%c0_47, %c0_48] : memref<16x128xf32, #tpu.memory_space<vmem>>, vector<16x128xf32>
    %cst_49 = arith.constant 6.500000e-01 : f32
    %72 = vector.broadcast %cst_49 : f32 to vector<16x128xf32>
    %73 = arith.mulf %72, %70 : vector<16x128xf32>
    %cst_50 = arith.constant 1.000000e+00 : f32
    %74 = vector.broadcast %cst_50 : f32 to vector<16x128xf32>
    %75 = arith.mulf %71, %74 : vector<16x128xf32>
    %76 = arith.subf %73, %75 : vector<16x128xf32>
    %c0_51 = arith.constant 0 : index
    %c0_52 = arith.constant 0 : index
    %77 = vector.load %arg15[%c0_51, %c0_52] : memref<64x128xf32, #tpu.memory_space<vmem>>, vector<16x128xf32>
    %78 = arith.addf %77, %76 : vector<16x128xf32>
    %cst_53 = arith.constant 0.000000e+00 : f32
    %79 = vector.broadcast %cst_53 : f32 to vector<16x128xf32>
    %80 = arith.cmpf oge, %78, %79 : vector<16x128xf32>
    %81 = arith.extui %80 : vector<16x128xi1> to vector<16x128xi32>
    %82 = arith.sitofp %81 : vector<16x128xi32> to vector<16x128xf32>
    %83 = arith.truncf %82 : vector<16x128xf32> to vector<16x128xbf16>
    %c0_54 = arith.constant 0 : index
    %c0_55 = arith.constant 0 : index
    %84 = vector.load %arg8[%c0_54, %c0_55] : memref<64x128xbf16, #tpu.memory_space<vmem>>, vector<16x128xbf16>
    tpu.vector_store %arg8[%c0_54, %c0_55], %83 {strides = array<i32>} : memref<64x128xbf16, #tpu.memory_space<vmem>>, vector<16x128xbf16>,
    %cst_56 = arith.constant 6.500000e-01 : f32
    %85 = vector.broadcast %cst_56 : f32 to vector<16x128xf32>
    %86 = arith.mulf %85, %76 : vector<16x128xf32>
    %cst_57 = arith.constant 1.000000e+00 : f32
    %87 = vector.broadcast %cst_57 : f32 to vector<16x128xf32>
    %88 = arith.mulf %82, %87 : vector<16x128xf32>
    %89 = arith.subf %86, %88 : vector<16x128xf32>
    %c16_58 = arith.constant 16 : index
    %c0_59 = arith.constant 0 : index
    %90 = vector.load %arg15[%c16_58, %c0_59] : memref<64x128xf32, #tpu.memory_space<vmem>>, vector<16x128xf32>
    %91 = arith.addf %90, %89 : vector<16x128xf32>
    %cst_60 = arith.constant 0.000000e+00 : f32
    %92 = vector.broadcast %cst_60 : f32 to vector<16x128xf32>
    %93 = arith.cmpf oge, %91, %92 : vector<16x128xf32>
    %94 = arith.extui %93 : vector<16x128xi1> to vector<16x128xi32>
    %95 = arith.sitofp %94 : vector<16x128xi32> to vector<16x128xf32>
    %96 = arith.truncf %95 : vector<16x128xf32> to vector<16x128xbf16>
    %c16_61 = arith.constant 16 : index
    %c0_62 = arith.constant 0 : index
    %97 = vector.load %arg8[%c16_61, %c0_62] : memref<64x128xbf16, #tpu.memory_space<vmem>>, vector<16x128xbf16>
    tpu.vector_store %arg8[%c16_61, %c0_62], %96 {strides = array<i32>} : memref<64x128xbf16, #tpu.memory_space<vmem>>, vector<16x128xbf16>,
    %cst_63 = arith.constant 6.500000e-01 : f32
    %98 = vector.broadcast %cst_63 : f32 to vector<16x128xf32>
    %99 = arith.mulf %98, %89 : vector<16x128xf32>
    %cst_64 = arith.constant 1.000000e+00 : f32
    %100 = vector.broadcast %cst_64 : f32 to vector<16x128xf32>
    %101 = arith.mulf %95, %100 : vector<16x128xf32>
    %102 = arith.subf %99, %101 : vector<16x128xf32>
    %c32_65 = arith.constant 32 : index
    %c0_66 = arith.constant 0 : index
    %103 = vector.load %arg15[%c32_65, %c0_66] : memref<64x128xf32, #tpu.memory_space<vmem>>, vector<16x128xf32>
    %104 = arith.addf %103, %102 : vector<16x128xf32>
    %cst_67 = arith.constant 0.000000e+00 : f32
    %105 = vector.broadcast %cst_67 : f32 to vector<16x128xf32>
    %106 = arith.cmpf oge, %104, %105 : vector<16x128xf32>
    %107 = arith.extui %106 : vector<16x128xi1> to vector<16x128xi32>
    %108 = arith.sitofp %107 : vector<16x128xi32> to vector<16x128xf32>
    %109 = arith.truncf %108 : vector<16x128xf32> to vector<16x128xbf16>
    %c32_68 = arith.constant 32 : index
    %c0_69 = arith.constant 0 : index
    %110 = vector.load %arg8[%c32_68, %c0_69] : memref<64x128xbf16, #tpu.memory_space<vmem>>, vector<16x128xbf16>
    tpu.vector_store %arg8[%c32_68, %c0_69], %109 {strides = array<i32>} : memref<64x128xbf16, #tpu.memory_space<vmem>>, vector<16x128xbf16>,
    %cst_70 = arith.constant 6.500000e-01 : f32
    %111 = vector.broadcast %cst_70 : f32 to vector<16x128xf32>
    %112 = arith.mulf %111, %102 : vector<16x128xf32>
    %cst_71 = arith.constant 1.000000e+00 : f32
    %113 = vector.broadcast %cst_71 : f32 to vector<16x128xf32>
    %114 = arith.mulf %108, %113 : vector<16x128xf32>
    %115 = arith.subf %112, %114 : vector<16x128xf32>
    %c48_72 = arith.constant 48 : index
    %c0_73 = arith.constant 0 : index
    %116 = vector.load %arg15[%c48_72, %c0_73] : memref<64x128xf32, #tpu.memory_space<vmem>>, vector<16x128xf32>
    %117 = arith.addf %116, %115 : vector<16x128xf32>
    %cst_74 = arith.constant 0.000000e+00 : f32
    %118 = vector.broadcast %cst_74 : f32 to vector<16x128xf32>
    %119 = arith.cmpf oge, %117, %118 : vector<16x128xf32>
    %120 = arith.extui %119 : vector<16x128xi1> to vector<16x128xi32>
    %121 = arith.sitofp %120 : vector<16x128xi32> to vector<16x128xf32>
    %122 = arith.truncf %121 : vector<16x128xf32> to vector<16x128xbf16>
    %c48_75 = arith.constant 48 : index
    %c0_76 = arith.constant 0 : index
    %123 = vector.load %arg8[%c48_75, %c0_76] : memref<64x128xbf16, #tpu.memory_space<vmem>>, vector<16x128xbf16>
    tpu.vector_store %arg8[%c48_75, %c0_76], %122 {strides = array<i32>} : memref<64x128xbf16, #tpu.memory_space<vmem>>, vector<16x128xbf16>,
    %c0_77 = arith.constant 0 : index
    %c0_78 = arith.constant 0 : index
    %124 = vector.load %arg9[%c0_77, %c0_78] : memref<16x128xf32, #tpu.memory_space<vmem>>, vector<16x128xf32>
    tpu.vector_store %arg9[%c0_77, %c0_78], %117 {strides = array<i32>} : memref<16x128xf32, #tpu.memory_space<vmem>>, vector<16x128xf32>,
    %c0_79 = arith.constant 0 : index
    %c0_80 = arith.constant 0 : index
    %125 = vector.load %arg12[%c0_79, %c0_80] : memref<16x128xf32, #tpu.memory_space<vmem>>, vector<16x128xf32>
    tpu.vector_store %arg12[%c0_79, %c0_80], %115 {strides = array<i32>} : memref<16x128xf32, #tpu.memory_space<vmem>>, vector<16x128xf32>,
    %c0_81 = arith.constant 0 : index
    %c0_82 = arith.constant 0 : index
    %126 = vector.load %arg13[%c0_81, %c0_82] : memref<16x128xf32, #tpu.memory_space<vmem>>, vector<16x128xf32>
    tpu.vector_store %arg13[%c0_81, %c0_82], %121 {strides = array<i32>} : memref<16x128xf32, #tpu.memory_space<vmem>>, vector<16x128xf32>,
    return
  }
  func.func @transform_0(%arg0: i32) -> (i32, i32) {
    %c0_i32 = arith.constant 0 : i32
    %c0_i32_0 = arith.constant 0 : i32
    return %arg0, %c0_i32 : i32, i32
  }
  func.func @transform_1(%arg0: i32) -> (i32, i32) {
    %c0_i32 = arith.constant 0 : i32
    %c0_i32_0 = arith.constant 0 : i32
    %c0_i32_1 = arith.constant 0 : i32
    return %c0_i32, %c0_i32_0 : i32, i32
  }
  func.func @transform_2(%arg0: i32) -> (i32, i32) {
    %c0_i32 = arith.constant 0 : i32
    %c0_i32_0 = arith.constant 0 : i32
    %c0_i32_1 = arith.constant 0 : i32
    return %c0_i32, %c0_i32_0 : i32, i32
  }
  func.func @transform_3(%arg0: i32) -> (i32, i32) {
    %c0_i32 = arith.constant 0 : i32
    %c0_i32_0 = arith.constant 0 : i32
    %c0_i32_1 = arith.constant 0 : i32
    return %c0_i32, %c0_i32_0 : i32, i32
  }
  func.func @transform_4(%arg0: i32) -> (i32, i32) {
    %c0_i32 = arith.constant 0 : i32
    %c0_i32_0 = arith.constant 0 : i32
    %c0_i32_1 = arith.constant 0 : i32
    return %c0_i32, %c0_i32_0 : i32, i32
  }
  func.func @transform_5(%arg0: i32) -> (i32, i32) {
    %c0_i32 = arith.constant 0 : i32
    %c0_i32_0 = arith.constant 0 : i32
    %c0_i32_1 = arith.constant 0 : i32
    return %c0_i32, %c0_i32_0 : i32, i32
  }
  func.func @transform_6(%arg0: i32) -> (i32, i32) {
    %c0_i32 = arith.constant 0 : i32
    %c0_i32_0 = arith.constant 0 : i32
    %c0_i32_1 = arith.constant 0 : i32
    return %c0_i32, %c0_i32_0 : i32, i32
  }
  func.func @transform_7(%arg0: i32) -> (i32, i32) {
    %c0_i32 = arith.constant 0 : i32
    %c0_i32_0 = arith.constant 0 : i32
    return %arg0, %c0_i32 : i32, i32
  }
  func.func @transform_8(%arg0: i32) -> (i32, i32) {
    %c0_i32 = arith.constant 0 : i32
    %c0_i32_0 = arith.constant 0 : i32
    %c0_i32_1 = arith.constant 0 : i32
    return %c0_i32, %c0_i32_0 : i32, i32
  }
  func.func @transform_9(%arg0: i32) -> (i32, i32) {
    %c0_i32 = arith.constant 0 : i32
    %c0_i32_0 = arith.constant 0 : i32
    %c0_i32_1 = arith.constant 0 : i32
    return %c0_i32, %c0_i32_0 : i32, i32
  }
  func.func @transform_10(%arg0: i32) -> (i32, i32) {
    %c0_i32 = arith.constant 0 : i32
    %c0_i32_0 = arith.constant 0 : i32
    %c0_i32_1 = arith.constant 0 : i32
    return %c0_i32, %c0_i32_0 : i32, i32
  }
  func.func @transform_11(%arg0: i32) -> (i32, i32) {
    %c0_i32 = arith.constant 0 : i32
    %c0_i32_0 = arith.constant 0 : i32
    %c0_i32_1 = arith.constant 0 : i32
    return %c0_i32, %c0_i32_0 : i32, i32
  }
  func.func @transform_12(%arg0: i32) -> (i32, i32) {
    %c0_i32 = arith.constant 0 : i32
    %c0_i32_0 = arith.constant 0 : i32
    %c0_i32_1 = arith.constant 0 : i32
    return %c0_i32, %c0_i32_0 : i32, i32
  }
}

</mosaic_0001>

<bundles_post_ra>
// kernel: _run_net_impl.3
= control target key start
LH: loop header
LB: loop body
LE: loop exit
PB: predicated region body
PF: predicated region fallthrough
CT: control target
= control target key end

     0   :  { %18 = vsyncpa [#allocation5], 0  ;;  %s1009_s0 = inlined_call_operand.vmem [shape: bf16[64,128], index: 0, kind: input, shape index: {}]   ;;  %s1010_s1 = inlined_call_operand.vmem [shape: f32[16,128], index: 1, kind: input, shape index: {}]   ;;  %s1011_s2 = inlined_call_operand.vmem [shape: f32[16,128], index: 2, kind: input, shape index: {}]   ;;  %s1012_s3 = inlined_call_operand.vmem [shape: f32[16,128], index: 3, kind: input, shape index: {}]   ;;  %s1013_s4 = inlined_call_operand.hbm [shape: f32[16,128], index: 4, kind: input, shape index: {}]   ;;  %s1014_s5 = inlined_call_operand.hbm [shape: bf16[128,128], index: 5, kind: input, shape index: {}]   ;;  %s1015_s6 = inlined_call_operand.vmem [shape: f32[1,128], index: 6, kind: input, shape index: {}]   ;;  %s1016_s7 = inlined_call_operand.hbm [shape: bf16[64,128], index: 7, kind: output, shape index: {0}]   ;;  %s1017_s8 = inlined_call_operand.hbm [shape: f32[16,128], index: 8, kind: output, shape index: {1}]   ;;  %s1018_s9 = inlined_call_operand.hbm [shape: f32[16,128], index: 9, kind: output, shape index: {2}]   ;;  %s1019_s10 = inlined_call_operand.hbm [shape: f32[16,128], index: 10, kind: output, shape index: {3}]   ;;  %s1020_s11 = inlined_call_operand.hbm [shape: f32[16,128], index: 11, kind: output, shape index: {4}]   ;;  %s1021_s12 = inlined_call_operand.vmem [shape: f32[16,128], index: 12, kind: output, shape index: {5}]  }
   0x1   :  { %19 = vsyncpa [#allocation8], 0 }
   0x2   :  { %20 = vsyncpa [#allocation6], 0 }
   0x3   :  { %21 = vsyncpa [#allocation11], 0 }
   0x4   :  { %22 = vsyncpa [#allocation14], 0  ;;  %s35_s23 = sshll.u32 %s1013_s4, 4  ;;  %s828_s24 = smov [#allocation4]   ;;  %s36_s23 = int_to_ptr.hbm [resolvable:$true] %s35_s23 }
   0x5   :  { %s37_s25 = sshll.u32 %s828_s24, 4  ;;  %s48_s28 = sshll.u32 %s1014_s5, 4  ;;  %s38_s25 = int_to_ptr.vmem [resolvable:$true] %s37_s25  ;;  %s49_s28 = int_to_ptr.hbm [resolvable:$true] %s48_s28 }
   0x6   :  { %s829_s29 = smov 128   ;;  %s830_s30 = smov 8  }
   0x7   :  { %43 = dma.hbm_to_vmem [thread:$0]  %s36_s23, 256, %s38_s25, [#allocation5], %s829_s29, %s829_s29, %s830_s30  }
   0x8   :  { %s831_s13 = smov [#allocation7]   ;;  %s832_s15 = smov 64  }
   0x9   :  { %s50_s14 = sshll.u32 %s831_s13, 4  ;;  %s833_s4 = smov 4   ;;  %s51_s14 = int_to_ptr.vmem [resolvable:$true] %s50_s14 }
   0xa   :  { %56 = dma.hbm_to_vmem [thread:$0]  %s49_s28, 1024, %s51_s14, [#allocation8], %s832_s15, %s832_s15, %s833_s4  }
   0xb   :  { %818 = dma.done.wait [#allocation5], 256  }
   0xc   :  { %819 = vsyncadd [#allocation5], 4294967040 }
   0xd   :  { %820 = dma.done.wait [#allocation8], 1024  }
   0xe   :  { %821 = vsyncadd [#allocation8], 4294966272  ;;  %v551_v0 = vld [vmem:[#allocation7 + $0x38] sm:$0xff]  ;;  %v550_v1 = vld [vmem:[#allocation7 + $0x30] sm:$0xff]  ;;  %s834_s17 = smov [#allocation13]   ;;  %s439_s21 = sshll.u32 %s1019_s10, 4  ;;  %s440_s21 = int_to_ptr.hbm [resolvable:$true] %s439_s21 }
   0xf   :  { %275 = vmatpush.bf16.msra.mxu0 %v551_v0  ;;  %613 = vmatpush.bf16.msra.mxu1 %v551_v0  ;;  %v71_v2 = vld [vmem:[%s1010_s1] sm:$0xff]  ;;  %v72_v3 = vld [vmem:[%s1010_s1 + $0x8] sm:$0xff]  ;;  %v549_v16 = vld [vmem:[#allocation7 + $0x28] sm:$0xff]  ;;  %s437_s18 = sshll.u32 %s834_s17, 4  ;;  %s413_s24 = sshll.u32 %s1017_s8, 4  ;;  %s438_s18 = int_to_ptr.vmem [resolvable:$true] %s437_s18  ;;  %s414_s24 = int_to_ptr.hbm [resolvable:$true] %s413_s24 }
  0x10   :  { %614 = vmatpush.bf16.msra.mxu2 %v551_v0  ;;  %615 = vmatpush.bf16.msra.mxu3 %v551_v0  ;;  %v75_v4 = vld [vmem:[%s1011_s2] sm:$0xff]  ;;  %v76_v5 = vld [vmem:[%s1011_s2 + $0x8] sm:$0xff]  ;;  %v112_v6 = vmul.f32 0.9, %v71_v2  ;;  %v113_v7 = vmul.f32 0.9, %v72_v3 }
  0x11   :  { %v114_v8 = vmul.f32 10.0, %v75_v4  ;;  %v115_v9 = vmul.f32 10.0, %v76_v5  ;;  %v557_v10 = vld [vmem:[%s1009_s0] sm:$0xff]   ;;  %v604_v11 = vld [vmem:[%s1009_s0 + $0x8] sm:$0xff]   ;;  %v118_v14 = vmul.f32 0.85, %v75_v4 }
  0x12   :  { %v558_v12 = vunpack.c.l.bf16 %v557_v10  ;;  %v559_v13 = vunpack.c.h.bf16 %v557_v10  ;;  %v119_v15 = vmul.f32 0.85, %v76_v5  ;;  %v567_v19 = vunpack.c.l.bf16 %v604_v11  ;;  %v606_v23 = vld [vmem:[%s1009_s0 + $0x10] sm:$0xff]   ;;  %v547_v42 = vld [vmem:[#allocation7 + $0x18] sm:$0xff]  ;;  %v546_v53 = vld [vmem:[#allocation7 + $0x10] sm:$0xff]  ;;  %s837_s1 = smov [#allocation15]  }
  0x13   :  { %276 = vmatpush.bf16.msra.mxu0 %v550_v1  ;;  %616 = vmatpush.bf16.msra.mxu1 %v550_v1  ;;  %v116_v17 = vadd.f32 %v114_v8, %v112_v6  ;;  %v117_v18 = vadd.f32 %v115_v9, %v113_v7  ;;  %v568_v20 = vunpack.c.h.bf16 %v604_v11  ;;  %v548_v31 = vld [vmem:[#allocation7 + $0x20] sm:$0xff]  ;;  %v576_v32 = vunpack.c.l.bf16 %v606_v23  ;;  %v545_v62 = vld [vmem:[#allocation7 + $0x8] sm:$0xff]  ;;  %v79_v7 = vld [vmem:[%s1012_s3] sm:$0xff]  ;;  %s450_s2 = sshll.u32 %s837_s1, 4  ;;  %s452_s13 = sshll.u32 %s1020_s11, 4  ;;  %s451_s2 = int_to_ptr.vmem [resolvable:$true] %s450_s2  ;;  %s453_s13 = int_to_ptr.hbm [resolvable:$true] %s452_s13 }
  0x14   :  { %617 = vmatpush.bf16.msra.mxu2 %v550_v1  ;;  %618 = vmatpush.bf16.msra.mxu3 %v550_v1  ;;  %v120_v21 = vmul.f32 6.6666665, %v558_v12  ;;  %v121_v22 = vmul.f32 6.6666665, %v559_v13  ;;  %v140_v29 = vmul.f32 6.6666665, %v567_v19  ;;  %v577_v33 = vunpack.c.h.bf16 %v606_v23 }
  0x15   :  { %v563_v24 = vpack.c.bf16 %v117_v18, %v116_v17  ;;  %v132_v25 = vmul.f32 0.9, %v116_v17  ;;  %v133_v26 = vmul.f32 0.9, %v117_v18  ;;  %v141_v30 = vmul.f32 6.6666665, %v568_v20 }
  0x16   :  { %v122_v27 = vadd.f32 %v120_v21, %v118_v14  ;;  %v123_v28 = vadd.f32 %v121_v22, %v119_v15  ;;  %v160_v43 = vmul.f32 6.6666665, %v576_v32  ;;  %v161_v44 = vmul.f32 6.6666665, %v577_v33  ;;  %v544_v2 = vld [vmem:[#allocation7] sm:$0xff]  ;;  %v83_v9 = vld [vmem:[#allocation4] sm:$0xff] }
  0x17   :  { %277 = vmatpush.bf16.msra.mxu0 %v549_v16  ;;  %619 = vmatpush.bf16.msra.mxu1 %v549_v16  ;;  %564 = vst [vmem:[#allocation2 + $0x10] sm:$0xff] %v563_v24   ;;  %v316_v8 = vmul.f32 0.65, %v79_v7  ;;  %v608_v10 = vld [vmem:[%s1009_s0 + $0x18] sm:$0xff]   ;;  %v947_v11 = vld [vmem:[%s1015_s6] ss:$0 sm:$0xff] }
  0x18   :  { %620 = vmatpush.bf16.msra.mxu2 %v549_v16  ;;  %621 = vmatpush.bf16.msra.mxu3 %v549_v16  ;;  %v134_v34 = vmul.f32 10.0, %v122_v27  ;;  %v135_v35 = vmul.f32 10.0, %v123_v28  ;;  %v138_v36 = vmul.f32 0.85, %v122_v27  ;;  %v139_v37 = vmul.f32 0.85, %v123_v28 }
  0x19   :  { %v585_v12 = vunpack.c.l.bf16 %v608_v10  ;;  %v586_v13 = vunpack.c.h.bf16 %v608_v10  ;;  %v318_v14 = vsub.f32 %v316_v8, %v83_v9  ;;  %v80_v19 = vld [vmem:[%s1012_s3 + $0x8] sm:$0xff]  ;;  %s836_s3 = smov [#allocation10]   ;;  %s838_s8 = smov [#allocation12]  }
  0x1a   :  { %v136_v38 = vadd.f32 %v134_v34, %v132_v25  ;;  %v137_v39 = vadd.f32 %v135_v35, %v133_v26  ;;  %v142_v40 = vadd.f32 %v140_v29, %v138_v36  ;;  %v143_v41 = vadd.f32 %v141_v30, %v139_v37  ;;  %v84_v28 = vld [vmem:[#allocation4 + $0x8] sm:$0xff]  ;;  %s970_s6 = sshll.u32 %s836_s3, 4  ;;  %s424_s14 = sshll.u32 %s838_s8, 4  ;;  %s412_s6 = int_to_ptr.vmem [resolvable:$true] %s970_s6  ;;  %s425_s14 = int_to_ptr.vmem [resolvable:$true] %s424_s14 }
  0x1b   :  { %278 = vmatpush.bf16.msra.mxu0 %v548_v31  ;;  %622 = vmatpush.bf16.msra.mxu1 %v548_v31  ;;  %v180_v17 = vmul.f32 6.6666665, %v585_v12  ;;  %v181_v20 = vmul.f32 6.6666665, %v586_v13  ;;  %v334_v26 = vmul.f32 0.65, %v318_v14 }
  0x1c   :  { %623 = vmatpush.bf16.msra.mxu2 %v548_v31  ;;  %624 = vmatpush.bf16.msra.mxu3 %v548_v31  ;;  %v572_v45 = vpack.c.bf16 %v137_v39, %v136_v38  ;;  %v152_v46 = vmul.f32 0.9, %v136_v38  ;;  %v153_v47 = vmul.f32 0.9, %v137_v39  ;;  %v154_v48 = vmul.f32 10.0, %v142_v40  ;;  %s426_s17 = sshll.u32 %s1018_s9, 4  ;;  %s427_s17 = int_to_ptr.hbm [resolvable:$true] %s426_s17 }
  0x1d   :  { %v155_v49 = vmul.f32 10.0, %v143_v41  ;;  %v158_v50 = vmul.f32 0.85, %v142_v40  ;;  %v159_v51 = vmul.f32 0.85, %v143_v41  ;;  %v835_v30 = vmov 0.0  }
  0x1e   :  { %605 = vst [vmem:[#allocation2] sm:$0xff] %v572_v45   ;;  %v156_v52 = vadd.f32 %v154_v48, %v152_v46  ;;  %v552_v3 = vld [vmem:[#allocation2 + $0x10] sm:$0xff]  ;;  %v317_v27 = vmul.f32 0.65, %v80_v19 }
  0x1f   :  { %279 = vmatpush.bf16.msra.mxu0 %v547_v42  ;;  %625 = vmatpush.bf16.msra.mxu1 %v547_v42  ;;  %v157_v54 = vadd.f32 %v155_v49, %v153_v47  ;;  %v162_v55 = vadd.f32 %v160_v43, %v158_v50  ;;  %v163_v56 = vadd.f32 %v161_v44, %v159_v51 }
  0x20   :  { %626 = vmatpush.bf16.msra.mxu2 %v547_v42  ;;  %627 = vmatpush.bf16.msra.mxu3 %v547_v42  ;;  %v172_v57 = vmul.f32 0.9, %v156_v52  ;;  %v319_v33 = vsub.f32 %v317_v27, %v84_v28 }
  0x21   :  { %v581_v58 = vpack.c.bf16 %v157_v54, %v156_v52  ;;  %v173_v59 = vmul.f32 0.9, %v157_v54  ;;  %v174_v60 = vmul.f32 10.0, %v162_v55  ;;  %v175_v61 = vmul.f32 10.0, %v163_v56 }
  0x22   :  { %v178_v15 = vmul.f32 0.85, %v162_v55  ;;  %v179_v16 = vmul.f32 0.85, %v163_v56  ;;  %v335_v38 = vmul.f32 0.65, %v319_v33 }
  0x23   :  { %280 = vmatpush.bf16.msra.mxu0 %v546_v53  ;;  %628 = vmatpush.bf16.msra.mxu1 %v546_v53  ;;  %607 = vst [vmem:[#allocation2 + $0x18] sm:$0xff] %v581_v58   ;;  %v176_v63 = vadd.f32 %v174_v60, %v172_v57  ;;  %v177_v0 = vadd.f32 %v175_v61, %v173_v59 }
  0x24   :  { %629 = vmatpush.bf16.msra.mxu2 %v546_v53  ;;  %630 = vmatpush.bf16.msra.mxu3 %v546_v53  ;;  %v182_v22 = vadd.f32 %v180_v17, %v178_v15  ;;  %v183_v24 = vadd.f32 %v181_v20, %v179_v16 }
  0x25   :  { %v590_v1 = vpack.c.bf16 %v177_v0, %v176_v63  ;;  %188 = vst [vmem:[#allocation12] sm:$0xff] %v176_v63  ;;  %v553_v4 = vld [vmem:[#allocation2] sm:$0xff] }
  0x26   :  { %189 = vst [vmem:[#allocation12 + $0x8] sm:$0xff] %v177_v0 }
  0x27   :  { %281 = vmatpush.bf16.msra.mxu0 %v545_v62  ;;  %631 = vmatpush.bf16.msra.mxu1 %v545_v62  ;;  %609 = vst [vmem:[#allocation2 + $0x8] sm:$0xff] %v590_v1  }
  0x28   :  { %632 = vmatpush.bf16.msra.mxu2 %v545_v62  ;;  %633 = vmatpush.bf16.msra.mxu3 %v545_v62  ;;  %190 = vst [vmem:[#allocation13] sm:$0xff] %v182_v22 }
  0x29   :  { %191 = vst [vmem:[#allocation13 + $0x8] sm:$0xff] %v183_v24 }
  0x2a   :  { %v554_v5 = vld [vmem:[#allocation2 + $0x18] sm:$0xff]  ;;  %445 = dma.vmem_to_hbm [thread:$0]  %s438_s18, 256, %s440_s21, [#allocation14], %s829_s29, %s829_s29, %s830_s30  }
  0x2b   :  { %282 = vmatpush.bf16.msra.mxu0 %v544_v2  ;;  %634 = vmatpush.bf16.msra.mxu1 %v544_v2  ;;  %s839_s18 = smov [#allocation9]   ;;  %s400_s21 = sshll.u32 %s1016_s7, 4  ;;  %s401_s21 = int_to_ptr.hbm [resolvable:$true] %s400_s21 }
  0x2c   :  { %635 = vmatpush.bf16.msra.mxu2 %v544_v2  ;;  %636 = vmatpush.bf16.msra.mxu3 %v544_v2  ;;  %s398_s11 = sshll.u32 %s839_s18, 4  ;;  %s399_s11 = int_to_ptr.vmem [resolvable:$true] %s398_s11 }
  0x2e   :  { %283 = vmatmul.bf16.vlgmr.msra.gmra.mxu0 %v552_v3  ;;  %288 = vmatmul.bf16.vlgmr.msra.gmra.mxu1 %v553_v4  ;;  %v555_v6 = vld [vmem:[#allocation2 + $0x8] sm:$0xff] }
  0x2f   :  { %293 = vmatmul.bf16.vlgmr.msra.gmra.mxu2 %v554_v5  ;;  %298 = vmatmul.bf16.vlgmr.msra.gmra.mxu3 %v555_v6 }
  0xab   :  { %v284_v18 = vpop.f32.mrf.mxu0  ;;  %v289_v23 = vpop.f32.mrf.mxu1 }
  0xac   :  { %v285_v21 = vadd.f32 %v947_v11, %v284_v18  ;;  %v290_v29 = vadd.f32 %v947_v11, %v289_v23 }
  0xae   :  { %v322_v25 = vadd.f32 %v318_v14, %v285_v21 }
  0xb0   :  { %vm324_vm0 = vcmp.ge.f32.partialorder %v322_v25, 0.0 }
  0xb1   :  { %v536_v31 = vsel %vm324_vm0, 1.0, %v835_v30 }
  0xb2   :  { %v336_v32 = vsub.f32 %v334_v26, %v536_v31  ;;  %v294_v34 = vpop.f32.mrf.mxu2  ;;  %v299_v46 = vpop.f32.mrf.mxu3 }
  0xb3   :  { %v286_v35 = vpop.f32.mrf.mxu0  ;;  %v295_v39 = vadd.f32 %v947_v11, %v294_v34  ;;  %v291_v43 = vpop.f32.mrf.mxu1  ;;  %v300_v52 = vadd.f32 %v947_v11, %v299_v46 }
  0xb4   :  { %v340_v36 = vadd.f32 %v336_v32, %v290_v29  ;;  %v287_v37 = vadd.f32 %v947_v11, %v286_v35  ;;  %v352_v40 = vmul.f32 0.65, %v336_v32  ;;  %v292_v49 = vadd.f32 %v947_v11, %v291_v43 }
  0xb6   :  { %vm342_vm1 = vcmp.ge.f32.partialorder %v340_v36, 0.0  ;;  %v323_v41 = vadd.f32 %v319_v33, %v287_v37 }
  0xb7   :  { %v538_v42 = vsel %vm342_vm1, 1.0, %v835_v30 }
  0xb8   :  { %v354_v44 = vsub.f32 %v352_v40, %v538_v42  ;;  %vm325_vm2 = vcmp.ge.f32.partialorder %v323_v41, 0.0 }
  0xb9   :  { %v537_v45 = vsel %vm325_vm2, 1.0, %v835_v30 }
  0xba   :  { %v358_v47 = vadd.f32 %v354_v44, %v295_v39  ;;  %v593_v48 = vpack.c.bf16 %v537_v45, %v536_v31  ;;  %v337_v50 = vsub.f32 %v335_v38, %v537_v45  ;;  %v370_v53 = vmul.f32 0.65, %v354_v44  ;;  %v296_v55 = vpop.f32.mrf.mxu2  ;;  %v301_v1 = vpop.f32.mrf.mxu3 }
  0xbb   :  { %v297_v61 = vadd.f32 %v947_v11, %v296_v55  ;;  %v302_v5 = vadd.f32 %v947_v11, %v301_v1 }
  0xbc   :  { %vm360_vm3 = vcmp.ge.f32.partialorder %v358_v47, 0.0  ;;  %594 = vst [vmem:[#allocation9] sm:$0xff] %v593_v48   ;;  %v341_v51 = vadd.f32 %v337_v50, %v292_v49  ;;  %v353_v57 = vmul.f32 0.65, %v337_v50 }
  0xbd   :  { %v540_v54 = vsel %vm360_vm3, 1.0, %v835_v30 }
  0xbe   :  { %vm343_vm4 = vcmp.ge.f32.partialorder %v341_v51, 0.0  ;;  %v372_v56 = vsub.f32 %v370_v53, %v540_v54 }
  0xbf   :  { %v539_v58 = vsel %vm343_vm4, 1.0, %v835_v30 }
  0xc0   :  { %v596_v59 = vpack.c.bf16 %v539_v58, %v538_v42  ;;  %v376_v60 = vadd.f32 %v372_v56, %v300_v52  ;;  %390 = vst [vmem:[#allocation15] sm:$0xff] %v372_v56  ;;  %v355_v62 = vsub.f32 %v353_v57, %v539_v58 }
  0xc2   :  { %610 = vst [vmem:[#allocation9 + $0x8] sm:$0xff] %v596_v59   ;;  %vm378_vm5 = vcmp.ge.f32.partialorder %v376_v60, 0.0  ;;  %v359_v63 = vadd.f32 %v355_v62, %v297_v61  ;;  %v371_v2 = vmul.f32 0.65, %v355_v62 }
  0xc3   :  { %v542_v0 = vsel %vm378_vm5, 1.0, %v835_v30  ;;  %388 = vst [vmem:[#allocation10] sm:$0xff] %v376_v60 }
  0xc4   :  { %392 = vst [vmem:[%s1021_s12] sm:$0xff] %v542_v0  ;;  %vm361_vm6 = vcmp.ge.f32.partialorder %v359_v63, 0.0 }
  0xc5   :  { %v541_v3 = vsel %vm361_vm6, 1.0, %v835_v30 }
  0xc6   :  { %v599_v4 = vpack.c.bf16 %v541_v3, %v540_v54  ;;  %v373_v6 = vsub.f32 %v371_v2, %v541_v3 }
  0xc8   :  { %611 = vst [vmem:[#allocation9 + $0x10] sm:$0xff] %v599_v4   ;;  %v377_v7 = vadd.f32 %v373_v6, %v302_v5 }
  0xc9   :  { %391 = vst [vmem:[#allocation15 + $0x8] sm:$0xff] %v373_v6 }
  0xca   :  { %vm379_vm7 = vcmp.ge.f32.partialorder %v377_v7, 0.0  ;;  %389 = vst [vmem:[#allocation10 + $0x8] sm:$0xff] %v377_v7  ;;  %458 = dma.vmem_to_hbm [thread:$0]  %s451_s2, 256, %s453_s13, [#allocation14], %s829_s29, %s829_s29, %s830_s30  }
  0xcb   :  { %v543_v8 = vsel %vm379_vm7, 1.0, %v835_v30  ;;  %419 = dma.vmem_to_hbm [thread:$0]  %s412_s6, 256, %s414_s24, [#allocation11], %s829_s29, %s829_s29, %s830_s30  }
  0xcc   :  { %v602_v9 = vpack.c.bf16 %v543_v8, %v542_v0  ;;  %393 = vst [vmem:[%s1021_s12 + $0x8] sm:$0xff] %v543_v8 }
  0xcd   :  { %432 = dma.vmem_to_hbm [thread:$0]  %s425_s14, 256, %s427_s17, [#allocation11], %s829_s29, %s829_s29, %s830_s30  }
  0xce   :  { %612 = vst [vmem:[#allocation9 + $0x18] sm:$0xff] %v602_v9  }
  0xcf   :  { %406 = dma.vmem_to_hbm [thread:$0]  %s399_s11, 512, %s401_s21, [#allocation6], %s832_s15, %s832_s15, %s833_s4  }
  0xd0   :  { %822 = dma.done.wait [#allocation6], 512  }
  0xd1   :  { %823 = vsyncadd [#allocation6], 4294966784 }
  0xd2   :  { %824 = dma.done.wait [#allocation11], 512  }
  0xd3   :  { %825 = vsyncadd [#allocation11], 4294966784 }
  0xd4   :  { %826 = dma.done.wait [#allocation14], 512  }
  0xd5   :  { %827 = vsyncadd [#allocation14], 4294966784 }
  0xd6   :  { %483 = vsyncpa [#allocation5], 1 }
  0xd7   :  { %484 = vsyncpa [#allocation8], 1 }
  0xd8   :  { %485 = vsyncpa [#allocation6], 1 }
  0xd9   :  { %486 = vsyncpa [#allocation11], 1 }
  0xda   :  { %487 = vsyncpa [#allocation14], 1 }

// kernel: _run_net_impl.2
= control target key start
LH: loop header
LB: loop body
LE: loop exit
PB: predicated region body
PF: predicated region fallthrough
CT: control target
= control target key end

     0   :  { %18 = vsyncpa [#allocation5], 0  ;;  %s1170_s0 = inlined_call_operand.hbm [shape: bf16[64,128], index: 0, kind: input, shape index: {}]   ;;  %s1171_s1 = inlined_call_operand.hbm [shape: f32[16,128], index: 1, kind: input, shape index: {}]   ;;  %s1172_s2 = inlined_call_operand.hbm [shape: f32[16,128], index: 2, kind: input, shape index: {}]   ;;  %s1173_s3 = inlined_call_operand.hbm [shape: f32[16,128], index: 3, kind: input, shape index: {}]   ;;  %s1174_s4 = inlined_call_operand.hbm [shape: f32[16,128], index: 4, kind: input, shape index: {}]   ;;  %s1175_s5 = inlined_call_operand.hbm [shape: bf16[128,128], index: 5, kind: input, shape index: {}]   ;;  %s1176_s6 = inlined_call_operand.hbm [shape: f32[1,128], index: 6, kind: input, shape index: {}]   ;;  %s1177_s7 = inlined_call_operand.vmem [shape: bf16[64,128], index: 7, kind: output, shape index: {0}]   ;;  %s1178_s8 = inlined_call_operand.hbm [shape: f32[16,128], index: 8, kind: output, shape index: {1}]   ;;  %s1179_s9 = inlined_call_operand.hbm [shape: f32[16,128], index: 9, kind: output, shape index: {2}]   ;;  %s1180_s10 = inlined_call_operand.hbm [shape: f32[16,128], index: 10, kind: output, shape index: {3}]   ;;  %s1181_s11 = inlined_call_operand.hbm [shape: f32[16,128], index: 11, kind: output, shape index: {4}]   ;;  %s1182_s12 = inlined_call_operand.vmem [shape: f32[16,128], index: 12, kind: output, shape index: {5}]  }
   0x1   :  { %19 = vsyncpa [#allocation8], 0 }
   0x2   :  { %20 = vsyncpa [#allocation11], 0 }
   0x3   :  { %21 = vsyncpa [#allocation14], 0 }
   0x4   :  { %22 = vsyncpa [#allocation6], 0 }
   0x5   :  { %23 = vsyncpa [#allocation18], 0  ;;  %s42_s23 = sshll.u32 %s1171_s1, 4  ;;  %s43_s23 = int_to_ptr.hbm [resolvable:$true] %s42_s23 }
   0x6   :  { %24 = vsyncpa [#allocation21], 0  ;;  %s996_s24 = smov [#allocation7]   ;;  %s68_s28 = sshll.u32 %s1173_s3, 4  ;;  %s69_s28 = int_to_ptr.hbm [resolvable:$true] %s68_s28 }
   0x7   :  { %s44_s25 = sshll.u32 %s996_s24, 4  ;;  %s997_s29 = smov 128   ;;  %s45_s25 = int_to_ptr.vmem [resolvable:$true] %s44_s25 }
   0x8   :  { %s998_s30 = smov 8   ;;  %s999_s13 = smov [#allocation10]  }
   0x9   :  { %50 = dma.hbm_to_vmem [thread:$0]  %s43_s23, 256, %s45_s25, [#allocation8], %s997_s29, %s997_s29, %s998_s30  }
   0xa   :  { %s70_s14 = sshll.u32 %s999_s13, 4  ;;  %s94_s16 = sshll.u32 %s1175_s5, 4  ;;  %s71_s14 = int_to_ptr.vmem [resolvable:$true] %s70_s14  ;;  %s95_s16 = int_to_ptr.hbm [resolvable:$true] %s94_s16 }
   0xb   :  { %76 = dma.hbm_to_vmem [thread:$0]  %s69_s28, 256, %s71_s14, [#allocation11], %s997_s29, %s997_s29, %s998_s30  }
   0xc   :  { %s1000_s3 = smov [#allocation13]   ;;  %s29_s20 = sshll.u32 %s1170_s0, 4  ;;  %s30_s20 = int_to_ptr.hbm [resolvable:$true] %s29_s20 }
   0xd   :  { %s96_s17 = sshll.u32 %s1000_s3, 4  ;;  %s1001_s21 = smov 64   ;;  %s97_s17 = int_to_ptr.vmem [resolvable:$true] %s96_s17 }
   0xe   :  { %s1002_s22 = smov 4   ;;  %s1003_s23 = smov [#allocation4]  }
   0xf   :  { %102 = dma.hbm_to_vmem [thread:$0]  %s95_s16, 1024, %s97_s17, [#allocation14], %s1001_s21, %s1001_s21, %s1002_s22  }
  0x10   :  { %s31_s24 = sshll.u32 %s1003_s23, 4  ;;  %s55_s27 = sshll.u32 %s1172_s2, 4  ;;  %s32_s24 = int_to_ptr.vmem [resolvable:$true] %s31_s24  ;;  %s56_s27 = int_to_ptr.hbm [resolvable:$true] %s55_s27 }
  0x11   :  { %37 = dma.hbm_to_vmem [thread:$0]  %s30_s20, 512, %s32_s24, [#allocation5], %s1001_s21, %s1001_s21, %s1002_s22  }
  0x12   :  { %s81_s13 = sshll.u32 %s1174_s4, 4  ;;  %s1004_s14 = smov [#allocation9]   ;;  %s82_s13 = int_to_ptr.hbm [resolvable:$true] %s81_s13 }
  0x13   :  { %s57_s1 = sshll.u32 %s1004_s14, 4  ;;  %s1005_s0 = smov [#allocation12]   ;;  %s58_s1 = int_to_ptr.vmem [resolvable:$true] %s57_s1 }
  0x14   :  { %63 = dma.hbm_to_vmem [thread:$0]  %s56_s27, 256, %s58_s1, [#allocation8], %s997_s29, %s997_s29, %s998_s30  }
  0x15   :  { %s83_s15 = sshll.u32 %s1005_s0, 4  ;;  %s108_s2 = sshll.u32 %s1176_s6, 4  ;;  %s84_s15 = int_to_ptr.vmem [resolvable:$true] %s83_s15  ;;  %s109_s2 = int_to_ptr.hbm [resolvable:$true] %s108_s2 }
  0x16   :  { %89 = dma.hbm_to_vmem [thread:$0]  %s82_s13, 256, %s84_s15, [#allocation11], %s997_s29, %s997_s29, %s998_s30  }
  0x17   :  { %s1006_s4 = smov [#allocation15]  }
  0x18   :  { %s110_s17 = sshll.u32 %s1006_s4, 4  ;;  %s111_s17 = int_to_ptr.vmem [resolvable:$true] %s110_s17 }
  0x19   :  { %113 = dma.hbm_to_vmem [thread:$0]  %s109_s2, 16, %s111_s17, [#allocation14]  }
  0x1a   :  { %982 = dma.done.wait [#allocation5], 512  }
  0x1b   :  { %983 = vsyncadd [#allocation5], 4294966784 }
  0x1c   :  { %984 = dma.done.wait [#allocation8], 512  }
  0x1d   :  { %985 = vsyncadd [#allocation8], 4294966784 }
  0x1e   :  { %986 = dma.done.wait [#allocation11], 512  }
  0x1f   :  { %987 = vsyncadd [#allocation11], 4294966784 }
  0x20   :  { %988 = dma.done.wait [#allocation14], 1040  }
  0x21   :  { %989 = vsyncadd [#allocation14], 4294966256  ;;  %v615_v0 = vld [vmem:[#allocation13 + $0x38] sm:$0xff]  ;;  %v614_v1 = vld [vmem:[#allocation13 + $0x30] sm:$0xff]  ;;  %s1007_s6 = smov [#allocation17]   ;;  %s490_s21 = sshll.u32 %s1179_s9, 4  ;;  %s491_s21 = int_to_ptr.hbm [resolvable:$true] %s490_s21 }
  0x22   :  { %350 = vmatpush.bf16.msra.mxu0 %v615_v0  ;;  %677 = vmatpush.bf16.msra.mxu1 %v615_v0  ;;  %v146_v2 = vld [vmem:[#allocation7] sm:$0xff]  ;;  %v147_v3 = vld [vmem:[#allocation7 + $0x8] sm:$0xff]  ;;  %v150_v4 = vld [vmem:[#allocation9] sm:$0xff]  ;;  %s488_s18 = sshll.u32 %s1007_s6, 4  ;;  %s1008_s22 = smov [#allocation19]   ;;  %s489_s18 = int_to_ptr.vmem [resolvable:$true] %s488_s18 }
  0x23   :  { %678 = vmatpush.bf16.msra.mxu2 %v615_v0  ;;  %679 = vmatpush.bf16.msra.mxu3 %v615_v0  ;;  %v151_v5 = vld [vmem:[#allocation9 + $0x8] sm:$0xff]  ;;  %v187_v6 = vmul.f32 0.9, %v146_v2  ;;  %v188_v7 = vmul.f32 0.9, %v147_v3  ;;  %v189_v8 = vmul.f32 10.0, %v150_v4 }
  0x24   :  { %v190_v9 = vmul.f32 10.0, %v151_v5  ;;  %v621_v10 = vld [vmem:[#allocation4] sm:$0xff]   ;;  %v668_v11 = vld [vmem:[#allocation4 + $0x8] sm:$0xff]   ;;  %v193_v14 = vmul.f32 0.85, %v150_v4  ;;  %v670_v23 = vld [vmem:[#allocation4 + $0x10] sm:$0xff]  }
  0x25   :  { %v622_v12 = vunpack.c.l.bf16 %v621_v10  ;;  %v623_v13 = vunpack.c.h.bf16 %v621_v10  ;;  %v194_v15 = vmul.f32 0.85, %v151_v5  ;;  %v613_v16 = vld [vmem:[#allocation13 + $0x28] sm:$0xff]  ;;  %v191_v17 = vadd.f32 %v189_v8, %v187_v6  ;;  %v612_v31 = vld [vmem:[#allocation13 + $0x20] sm:$0xff]  ;;  %v611_v42 = vld [vmem:[#allocation13 + $0x18] sm:$0xff]  ;;  %s501_s23 = sshll.u32 %s1008_s22, 4  ;;  %s502_s23 = int_to_ptr.vmem [resolvable:$true] %s501_s23 }
  0x26   :  { %351 = vmatpush.bf16.msra.mxu0 %v614_v1  ;;  %680 = vmatpush.bf16.msra.mxu1 %v614_v1  ;;  %v192_v18 = vadd.f32 %v190_v9, %v188_v7  ;;  %v631_v19 = vunpack.c.l.bf16 %v668_v11  ;;  %v632_v20 = vunpack.c.h.bf16 %v668_v11  ;;  %v640_v32 = vunpack.c.l.bf16 %v670_v23  ;;  %v610_v53 = vld [vmem:[#allocation13 + $0x10] sm:$0xff]  ;;  %v609_v62 = vld [vmem:[#allocation13 + $0x8] sm:$0xff]  ;;  %v608_v2 = vld [vmem:[#allocation13] sm:$0xff]  ;;  %s503_s9 = sshll.u32 %s1180_s10, 4  ;;  %s1010_s14 = smov [#allocation20]   ;;  %s504_s9 = int_to_ptr.hbm [resolvable:$true] %s503_s9 }
  0x27   :  { %681 = vmatpush.bf16.msra.mxu2 %v614_v1  ;;  %682 = vmatpush.bf16.msra.mxu3 %v614_v1  ;;  %v195_v21 = vmul.f32 6.6666665, %v622_v12  ;;  %v196_v22 = vmul.f32 6.6666665, %v623_v13  ;;  %v207_v25 = vmul.f32 0.9, %v191_v17  ;;  %v641_v33 = vunpack.c.h.bf16 %v670_v23 }
  0x28   :  { %v627_v24 = vpack.c.bf16 %v192_v18, %v191_v17  ;;  %v208_v26 = vmul.f32 0.9, %v192_v18  ;;  %v215_v29 = vmul.f32 6.6666665, %v631_v19  ;;  %v216_v30 = vmul.f32 6.6666665, %v632_v20 }
  0x29   :  { %v197_v27 = vadd.f32 %v195_v21, %v193_v14  ;;  %v198_v28 = vadd.f32 %v196_v22, %v194_v15  ;;  %v235_v43 = vmul.f32 6.6666665, %v640_v32  ;;  %v236_v44 = vmul.f32 6.6666665, %v641_v33  ;;  %v154_v7 = vld [vmem:[#allocation10] sm:$0xff]  ;;  %v158_v9 = vld [vmem:[#allocation12] sm:$0xff] }
  0x2a   :  { %352 = vmatpush.bf16.msra.mxu0 %v613_v16  ;;  %683 = vmatpush.bf16.msra.mxu1 %v613_v16  ;;  %628 = vst [vmem:[#allocation2 + $0x10] sm:$0xff] %v627_v24   ;;  %v391_v8 = vmul.f32 0.65, %v154_v7  ;;  %v672_v10 = vld [vmem:[#allocation4 + $0x18] sm:$0xff]   ;;  %v1116_v11 = vld [vmem:[#allocation15] ss:$0 sm:$0xff] }
  0x2b   :  { %684 = vmatpush.bf16.msra.mxu2 %v613_v16  ;;  %685 = vmatpush.bf16.msra.mxu3 %v613_v16  ;;  %v209_v34 = vmul.f32 10.0, %v197_v27  ;;  %v210_v35 = vmul.f32 10.0, %v198_v28  ;;  %v213_v36 = vmul.f32 0.85, %v197_v27  ;;  %v214_v37 = vmul.f32 0.85, %v198_v28 }
  0x2c   :  { %v649_v12 = vunpack.c.l.bf16 %v672_v10  ;;  %v650_v13 = vunpack.c.h.bf16 %v672_v10  ;;  %v393_v14 = vsub.f32 %v391_v8, %v158_v9  ;;  %v155_v19 = vld [vmem:[#allocation10 + $0x8] sm:$0xff]  ;;  %v159_v28 = vld [vmem:[#allocation12 + $0x8] sm:$0xff]  ;;  %s514_s1 = sshll.u32 %s1010_s14, 4  ;;  %s516_s16 = sshll.u32 %s1181_s11, 4  ;;  %s515_s1 = int_to_ptr.vmem [resolvable:$true] %s514_s1  ;;  %s517_s16 = int_to_ptr.hbm [resolvable:$true] %s516_s16 }
  0x2d   :  { %v211_v38 = vadd.f32 %v209_v34, %v207_v25  ;;  %v212_v39 = vadd.f32 %v210_v35, %v208_v26  ;;  %v217_v40 = vadd.f32 %v215_v29, %v213_v36  ;;  %v218_v41 = vadd.f32 %v216_v30, %v214_v37  ;;  %s1011_s3 = smov [#allocation16]   ;;  %s477_s6 = sshll.u32 %s1178_s8, 4  ;;  %s478_s6 = int_to_ptr.hbm [resolvable:$true] %s477_s6 }
  0x2e   :  { %353 = vmatpush.bf16.msra.mxu0 %v612_v31  ;;  %686 = vmatpush.bf16.msra.mxu1 %v612_v31  ;;  %v255_v17 = vmul.f32 6.6666665, %v649_v12  ;;  %v256_v20 = vmul.f32 6.6666665, %v650_v13  ;;  %v409_v26 = vmul.f32 0.65, %v393_v14 }
  0x2f   :  { %687 = vmatpush.bf16.msra.mxu2 %v612_v31  ;;  %688 = vmatpush.bf16.msra.mxu3 %v612_v31  ;;  %v636_v45 = vpack.c.bf16 %v212_v39, %v211_v38  ;;  %v227_v46 = vmul.f32 0.9, %v211_v38  ;;  %v228_v47 = vmul.f32 0.9, %v212_v39  ;;  %v229_v48 = vmul.f32 10.0, %v217_v40  ;;  %s475_s2 = sshll.u32 %s1011_s3, 4  ;;  %s476_s2 = int_to_ptr.vmem [resolvable:$true] %s475_s2 }
  0x30   :  { %v230_v49 = vmul.f32 10.0, %v218_v41  ;;  %v233_v50 = vmul.f32 0.85, %v217_v40  ;;  %v234_v51 = vmul.f32 0.85, %v218_v41  ;;  %v1009_v30 = vmov 0.0  }
  0x31   :  { %669 = vst [vmem:[#allocation2] sm:$0xff] %v636_v45   ;;  %v231_v52 = vadd.f32 %v229_v48, %v227_v46  ;;  %v616_v3 = vld [vmem:[#allocation2 + $0x10] sm:$0xff]  ;;  %v392_v27 = vmul.f32 0.65, %v155_v19 }
  0x32   :  { %354 = vmatpush.bf16.msra.mxu0 %v611_v42  ;;  %689 = vmatpush.bf16.msra.mxu1 %v611_v42  ;;  %v232_v54 = vadd.f32 %v230_v49, %v228_v47  ;;  %v237_v55 = vadd.f32 %v235_v43, %v233_v50  ;;  %v238_v56 = vadd.f32 %v236_v44, %v234_v51 }
  0x33   :  { %690 = vmatpush.bf16.msra.mxu2 %v611_v42  ;;  %691 = vmatpush.bf16.msra.mxu3 %v611_v42  ;;  %v247_v57 = vmul.f32 0.9, %v231_v52  ;;  %v394_v33 = vsub.f32 %v392_v27, %v159_v28 }
  0x34   :  { %v645_v58 = vpack.c.bf16 %v232_v54, %v231_v52  ;;  %v248_v59 = vmul.f32 0.9, %v232_v54  ;;  %v249_v60 = vmul.f32 10.0, %v237_v55  ;;  %v250_v61 = vmul.f32 10.0, %v238_v56 }
  0x35   :  { %v253_v15 = vmul.f32 0.85, %v237_v55  ;;  %v254_v16 = vmul.f32 0.85, %v238_v56  ;;  %v410_v38 = vmul.f32 0.65, %v394_v33 }
  0x36   :  { %355 = vmatpush.bf16.msra.mxu0 %v610_v53  ;;  %692 = vmatpush.bf16.msra.mxu1 %v610_v53  ;;  %671 = vst [vmem:[#allocation2 + $0x18] sm:$0xff] %v645_v58   ;;  %v251_v63 = vadd.f32 %v249_v60, %v247_v57  ;;  %v252_v0 = vadd.f32 %v250_v61, %v248_v59 }
  0x37   :  { %693 = vmatpush.bf16.msra.mxu2 %v610_v53  ;;  %694 = vmatpush.bf16.msra.mxu3 %v610_v53  ;;  %v257_v22 = vadd.f32 %v255_v17, %v253_v15  ;;  %v258_v24 = vadd.f32 %v256_v20, %v254_v16 }
  0x38   :  { %v654_v1 = vpack.c.bf16 %v252_v0, %v251_v63  ;;  %263 = vst [vmem:[#allocation17] sm:$0xff] %v251_v63  ;;  %v617_v4 = vld [vmem:[#allocation2] sm:$0xff] }
  0x39   :  { %264 = vst [vmem:[#allocation17 + $0x8] sm:$0xff] %v252_v0 }
  0x3a   :  { %356 = vmatpush.bf16.msra.mxu0 %v609_v62  ;;  %695 = vmatpush.bf16.msra.mxu1 %v609_v62  ;;  %673 = vst [vmem:[#allocation2 + $0x8] sm:$0xff] %v654_v1   ;;  %496 = dma.vmem_to_hbm [thread:$0]  %s489_s18, 256, %s491_s21, [#allocation18], %s997_s29, %s997_s29, %s998_s30  }
  0x3b   :  { %696 = vmatpush.bf16.msra.mxu2 %v609_v62  ;;  %697 = vmatpush.bf16.msra.mxu3 %v609_v62  ;;  %265 = vst [vmem:[#allocation19] sm:$0xff] %v257_v22 }
  0x3c   :  { %266 = vst [vmem:[#allocation19 + $0x8] sm:$0xff] %v258_v24 }
  0x3d   :  { %v618_v5 = vld [vmem:[#allocation2 + $0x18] sm:$0xff]  ;;  %509 = dma.vmem_to_hbm [thread:$0]  %s502_s23, 256, %s504_s9, [#allocation18], %s997_s29, %s997_s29, %s998_s30  }
  0x3e   :  { %357 = vmatpush.bf16.msra.mxu0 %v608_v2  ;;  %698 = vmatpush.bf16.msra.mxu1 %v608_v2 }
  0x3f   :  { %699 = vmatpush.bf16.msra.mxu2 %v608_v2  ;;  %700 = vmatpush.bf16.msra.mxu3 %v608_v2 }
  0x41   :  { %358 = vmatmul.bf16.vlgmr.msra.gmra.mxu0 %v616_v3  ;;  %363 = vmatmul.bf16.vlgmr.msra.gmra.mxu1 %v617_v4  ;;  %v619_v6 = vld [vmem:[#allocation2 + $0x8] sm:$0xff] }
  0x42   :  { %368 = vmatmul.bf16.vlgmr.msra.gmra.mxu2 %v618_v5  ;;  %373 = vmatmul.bf16.vlgmr.msra.gmra.mxu3 %v619_v6 }
  0xbe   :  { %v359_v18 = vpop.f32.mrf.mxu0  ;;  %v364_v23 = vpop.f32.mrf.mxu1 }
  0xbf   :  { %v360_v21 = vadd.f32 %v1116_v11, %v359_v18  ;;  %v365_v29 = vadd.f32 %v1116_v11, %v364_v23 }
  0xc1   :  { %v397_v25 = vadd.f32 %v393_v14, %v360_v21 }
  0xc3   :  { %vm399_vm0 = vcmp.ge.f32.partialorder %v397_v25, 0.0 }
  0xc4   :  { %v600_v31 = vsel %vm399_vm0, 1.0, %v1009_v30 }
  0xc5   :  { %v411_v32 = vsub.f32 %v409_v26, %v600_v31  ;;  %v369_v34 = vpop.f32.mrf.mxu2  ;;  %v374_v46 = vpop.f32.mrf.mxu3 }
  0xc6   :  { %v361_v35 = vpop.f32.mrf.mxu0  ;;  %v370_v39 = vadd.f32 %v1116_v11, %v369_v34  ;;  %v366_v43 = vpop.f32.mrf.mxu1  ;;  %v375_v52 = vadd.f32 %v1116_v11, %v374_v46 }
  0xc7   :  { %v415_v36 = vadd.f32 %v411_v32, %v365_v29  ;;  %v362_v37 = vadd.f32 %v1116_v11, %v361_v35  ;;  %v427_v40 = vmul.f32 0.65, %v411_v32  ;;  %v367_v49 = vadd.f32 %v1116_v11, %v366_v43 }
  0xc9   :  { %vm417_vm1 = vcmp.ge.f32.partialorder %v415_v36, 0.0  ;;  %v398_v41 = vadd.f32 %v394_v33, %v362_v37 }
  0xca   :  { %v602_v42 = vsel %vm417_vm1, 1.0, %v1009_v30 }
  0xcb   :  { %v429_v44 = vsub.f32 %v427_v40, %v602_v42  ;;  %vm400_vm2 = vcmp.ge.f32.partialorder %v398_v41, 0.0 }
  0xcc   :  { %v601_v45 = vsel %vm400_vm2, 1.0, %v1009_v30 }
  0xcd   :  { %v433_v47 = vadd.f32 %v429_v44, %v370_v39  ;;  %v657_v48 = vpack.c.bf16 %v601_v45, %v600_v31  ;;  %v412_v50 = vsub.f32 %v410_v38, %v601_v45  ;;  %v445_v53 = vmul.f32 0.65, %v429_v44  ;;  %v371_v55 = vpop.f32.mrf.mxu2  ;;  %v376_v1 = vpop.f32.mrf.mxu3 }
  0xce   :  { %v372_v61 = vadd.f32 %v1116_v11, %v371_v55  ;;  %v377_v5 = vadd.f32 %v1116_v11, %v376_v1 }
  0xcf   :  { %vm435_vm3 = vcmp.ge.f32.partialorder %v433_v47, 0.0  ;;  %658 = vst [vmem:[%s1177_s7] sm:$0xff] %v657_v48   ;;  %v416_v51 = vadd.f32 %v412_v50, %v367_v49  ;;  %v428_v57 = vmul.f32 0.65, %v412_v50 }
  0xd0   :  { %v604_v54 = vsel %vm435_vm3, 1.0, %v1009_v30 }
  0xd1   :  { %vm418_vm4 = vcmp.ge.f32.partialorder %v416_v51, 0.0  ;;  %v447_v56 = vsub.f32 %v445_v53, %v604_v54 }
  0xd2   :  { %v603_v58 = vsel %vm418_vm4, 1.0, %v1009_v30 }
  0xd3   :  { %v660_v59 = vpack.c.bf16 %v603_v58, %v602_v42  ;;  %v451_v60 = vadd.f32 %v447_v56, %v375_v52  ;;  %465 = vst [vmem:[#allocation20] sm:$0xff] %v447_v56  ;;  %v430_v62 = vsub.f32 %v428_v57, %v603_v58 }
  0xd5   :  { %674 = vst [vmem:[%s1177_s7 + $0x8] sm:$0xff] %v660_v59   ;;  %vm453_vm5 = vcmp.ge.f32.partialorder %v451_v60, 0.0  ;;  %v434_v63 = vadd.f32 %v430_v62, %v372_v61  ;;  %v446_v2 = vmul.f32 0.65, %v430_v62 }
  0xd6   :  { %v606_v0 = vsel %vm453_vm5, 1.0, %v1009_v30  ;;  %463 = vst [vmem:[#allocation16] sm:$0xff] %v451_v60 }
  0xd7   :  { %467 = vst [vmem:[%s1182_s12] sm:$0xff] %v606_v0  ;;  %vm436_vm6 = vcmp.ge.f32.partialorder %v434_v63, 0.0 }
  0xd8   :  { %v605_v3 = vsel %vm436_vm6, 1.0, %v1009_v30 }
  0xd9   :  { %v663_v4 = vpack.c.bf16 %v605_v3, %v604_v54  ;;  %v448_v6 = vsub.f32 %v446_v2, %v605_v3 }
  0xdb   :  { %675 = vst [vmem:[%s1177_s7 + $0x10] sm:$0xff] %v663_v4   ;;  %v452_v7 = vadd.f32 %v448_v6, %v377_v5 }
  0xdc   :  { %466 = vst [vmem:[#allocation20 + $0x8] sm:$0xff] %v448_v6 }
  0xdd   :  { %vm454_vm7 = vcmp.ge.f32.partialorder %v452_v7, 0.0  ;;  %464 = vst [vmem:[#allocation16 + $0x8] sm:$0xff] %v452_v7  ;;  %522 = dma.vmem_to_hbm [thread:$0]  %s515_s1, 256, %s517_s16, [#allocation21], %s997_s29, %s997_s29, %s998_s30  }
  0xde   :  { %v607_v8 = vsel %vm454_vm7, 1.0, %v1009_v30  ;;  %483 = dma.vmem_to_hbm [thread:$0]  %s476_s2, 256, %s478_s6, [#allocation6], %s997_s29, %s997_s29, %s998_s30  }
  0xdf   :  { %v666_v9 = vpack.c.bf16 %v607_v8, %v606_v0  ;;  %468 = vst [vmem:[%s1182_s12 + $0x8] sm:$0xff] %v607_v8 }
  0xe1   :  { %676 = vst [vmem:[%s1177_s7 + $0x18] sm:$0xff] %v666_v9  }
  0xe2   :  { %990 = dma.done.wait [#allocation6], 256  }
  0xe3   :  { %991 = vsyncadd [#allocation6], 4294967040 }
  0xe4   :  { %992 = dma.done.wait [#allocation18], 512  }
  0xe5   :  { %993 = vsyncadd [#allocation18], 4294966784 }
  0xe6   :  { %994 = dma.done.wait [#allocation21], 256  }
  0xe7   :  { %995 = vsyncadd [#allocation21], 4294967040 }
  0xe8   :  { %545 = vsyncpa [#allocation5], 1 }
  0xe9   :  { %546 = vsyncpa [#allocation8], 1 }
  0xea   :  { %547 = vsyncpa [#allocation11], 1 }
  0xeb   :  { %548 = vsyncpa [#allocation14], 1 }
  0xec   :  { %549 = vsyncpa [#allocation6], 1 }
  0xed   :  { %550 = vsyncpa [#allocation18], 1 }
  0xee   :  { %551 = vsyncpa [#allocation21], 1 }

</bundles_post_ra>
